<compile_context>
chip_gen: v7x
topology: tpu7x:2x2x1
jax: 0.10.0
libtpu: 0.0.40
codegen_flags: <defaults>
</compile_context>

<pallas_src>
import functools
import math

import jax
import jax.numpy as jnp
from jax import lax
from jax.experimental import pallas as pl
from jax.experimental.pallas import tpu as pltpu


# ---------------- config (small, consistent with the module) ----------------
HIDDEN = 32          # config.hidden_size
INTERMEDIATE = 64    # config.intermediate_size
NUM_HEADS = 4        # config.num_attention_heads
HEAD_DIM = HIDDEN // NUM_HEADS
NUM_LAYERS = 2       # config.num_hidden_layers
SEQ = 8              # seq_len (e.g. number of image patches)
BATCH = 2
EPS = 1e-6           # config.layer_norm_eps
GELU_C = math.sqrt(2.0 / math.pi)

PARAM_ORDER = ("ln", "wqkv", "bqkv", "wo", "bo", "w1", "b1", "w2", "b2")


def _approx_recip(x):
    # pl.reciprocal(approx=True) lowers to the (otherwise idle) EUP slot.
    if hasattr(pl, "reciprocal"):
        return pl.reciprocal(x, approx=True)
    return 1.0 / x


# ------------------------------ kernel body ---------------------------------
def _encoder_kernel(x_ref,                       # (rows, D)      input block
                    ln_ref,                      # (L, 4, D)      g1,b1,g2,b2 (f32)
                    wqkv_ref, bqkv_ref,          # (L, 3, D, D) / (L, 3, 1, D)
                    wo_ref, bo_ref,              # (L, D, D)    / (L, 1, D)
                    w1_ref, b1_ref,              # (L, D, I)    / (L, 1, I)
                    w2_ref, b2_ref,              # (L, I, D)    / (L, 1, D)
                    o_ref,                       # (rows, D)      output block
                    *, seq_len, num_heads, num_layers, eps):
    """Whole encoder stack in one grid step: straight-line loop over layers."""
    rows, d = x_ref.shape
    nb = rows // seq_len                         # images in this block
    hd = d // num_heads
    scale = hd ** -0.5
    cdt = wqkv_ref.dtype                         # MXU operand dtype (bf16 or f32)

    def layernorm(v, g, b):
        mu = jnp.mean(v, axis=-1, keepdims=True)
        var = jnp.mean(jnp.square(v - mu), axis=-1, keepdims=True)
        return (v - mu) * lax.rsqrt(var + eps) * g + b

    x = x_ref[...].astype(jnp.float32)           # resident hidden state (f32)

    # Static Python loop: the whole stack is one straight-line body for the
    # LLO scheduler (num_layers is small; no per-layer grid-step overhead).
    for layer in range(num_layers):
        ln = ln_ref[layer].astype(jnp.float32)   # (4, D)

        # ---- LayerNorm 1 + q/k/v: three matmuls against contiguous (D, D)
        #      weight slabs (no lane-subrange slicing of a fused qkv output).
        h1 = layernorm(x, ln[0:1], ln[1:2]).astype(cdt)
        q = jnp.dot(h1, wqkv_ref[layer, 0],
                    preferred_element_type=jnp.float32) + bqkv_ref[layer, 0]
        k = jnp.dot(h1, wqkv_ref[layer, 1],
                    preferred_element_type=jnp.float32) + bqkv_ref[layer, 1]
        v = jnp.dot(h1, wqkv_ref[layer, 2],
                    preferred_element_type=jnp.float32) + bqkv_ref[layer, 2]

        # ---- Fold heads into the leading batch axis ONCE (4 lane slices on a
        #      single stacked tensor + leading-dim concats; lane dim preserved
        #      by every reshape), so the attention core is two batched
        #      dot_generals over all (head, image) pairs.
        qkv_rows = jnp.concatenate([q, k, v], axis=0).astype(cdt)   # (3*rows, D)
        heads5 = jnp.concatenate(
            [qkv_rows[:, h * hd:(h + 1) * hd] for h in range(num_heads)],
            axis=0,
        ).reshape(num_heads, 3, nb, seq_len, hd)                    # (H,3,nb,S,hd)
        q_h = heads5[:, 0].reshape(num_heads * nb, seq_len, hd)
        k_h = heads5[:, 1].reshape(num_heads * nb, seq_len, hd)
        v_h = heads5[:, 2].reshape(num_heads * nb, seq_len, hd)

        # ---- scores + softmax + PV for ALL heads at once ----
        s = jnp.einsum("bqd,bkd->bqk", q_h, k_h,
                       preferred_element_type=jnp.float32) * scale
        s = s - jnp.max(s, axis=-1, keepdims=True)   # stable softmax (f32)
        p = jnp.exp(s)
        p = p * _approx_recip(jnp.sum(p, axis=-1, keepdims=True))
        ctx_h = jnp.einsum("bqk,bkd->bqd", p.astype(cdt), v_h,
                           preferred_element_type=jnp.float32)      # (H*nb, S, hd)

        # ---- merge heads back into lanes, ONE K=D out-projection matmul ----
        ctx3 = ctx_h.reshape(num_heads, rows, hd)                   # (H, rows, hd)
        ctx = jnp.concatenate([ctx3[h] for h in range(num_heads)],
                              axis=-1)                              # (rows, D)
        attn = jnp.dot(ctx.astype(cdt), wo_ref[layer],
                       preferred_element_type=jnp.float32) + bo_ref[layer]

        x = x + attn                                                # residual 1

        # ---- LayerNorm 2 + MLP (tanh GELU) ----
        h2 = layernorm(x, ln[2:3], ln[3:4]).astype(cdt)
        ff = jnp.dot(h2, w1_ref[layer],
                     preferred_element_type=jnp.float32) + b1_ref[layer]
        ff = 0.5 * ff * (1.0 + jnp.tanh(GELU_C * (ff + 0.044715 * ff * ff * ff)))
        ff = jnp.dot(ff.astype(cdt), w2_ref[layer],
                     preferred_element_type=jnp.float32) + b2_ref[layer]

        x = x + ff                                                  # residual 2

    o_ref[...] = x.astype(o_ref.dtype)


# ------------------------------ wrapper --------------------------------------
def _whole_spec(arr):
    """Whole-array block, constant index map: one DMA, VMEM resident."""
    zeros = (0,) * arr.ndim
    return pl.BlockSpec(tuple(arr.shape), lambda b, _z=zeros: _z)


def siglip_encoder(x, packed_params, *, num_heads=NUM_HEADS, eps=EPS,
                   batch_blocks=1):
    """Fused SigLipEncoder forward.  x: (B, S, D) float32.

    batch_blocks=1 processes the whole batch as one lane/sublane-dense block
    (best on single-TensorCore v5e/v6e).  batch_blocks=2 can shard the batch
    over the two v7x TensorCores via the "parallel" grid axis; the weight
    slabs use constant index maps, so they are NOT re-streamed per block.
    """
    B, S, D = x.shape
    num_layers = packed_params["wqkv"].shape[0]
    rows = B * S
    assert rows % batch_blocks == 0 and (rows // batch_blocks) % S == 0
    rb = rows // batch_blocks

    x2 = x.reshape(rows, D)                     # layout plumbing done in XLA
    args = [packed_params[name] for name in PARAM_ORDER]

    kernel = functools.partial(_encoder_kernel, seq_len=S, num_heads=num_heads,
                               num_layers=num_layers, eps=eps)

    in_specs = [pl.BlockSpec((rb, D), lambda b: (b, 0))]
    in_specs += [_whole_spec(a) for a in args]

    out = pl.pallas_call(
        kernel,
        out_shape=jax.ShapeDtypeStruct((rows, D), x.dtype),
        grid_spec=pltpu.PrefetchScalarGridSpec(
            num_scalar_prefetch=0,
            grid=(batch_blocks,),
            in_specs=in_specs,
            out_specs=pl.BlockSpec((rb, D), lambda b: (b, 0)),
        ),
        compiler_params=pltpu.CompilerParams(
            dimension_semantics=("parallel",),
            vmem_limit_bytes=32 * 1024 * 1024),
    )(x2, *args)
    return out.reshape(B, S, D)


# --------------------------- parameter construction --------------------------
def init_layer_params(key):
    ks = jax.random.split(key, 16)
    std = 0.02

    def lin(k, fi, fo):
        # (in, out) layout == PyTorch Linear weight transposed.
        return jax.random.normal(k, (fi, fo), jnp.float32) * std

    def vec(k, n, scale=0.01):
        return jax.random.normal(k, (n,), jnp.float32) * scale

    return {
        "ln1_g": 1.0 + vec(ks[0], HIDDEN, 0.05), "ln1_b": vec(ks[1], HIDDEN),
        "wq": lin(ks[2], HIDDEN, HIDDEN), "bq": vec(ks[3], HIDDEN),
        "wk": lin(ks[4], HIDDEN, HIDDEN), "bk": vec(ks[5], HIDDEN),
        "wv": lin(ks[6], HIDDEN, HIDDEN), "bv": vec(ks[7], HIDDEN),
        "wo": lin(ks[8], HIDDEN, HIDDEN), "bo": vec(ks[9], HIDDEN),
        "ln2_g": 1.0 + vec(ks[10], HIDDEN, 0.05), "ln2_b": vec(ks[11], HIDDEN),
        "w1": lin(ks[12], HIDDEN, INTERMEDIATE), "b1": vec(ks[13], INTERMEDIATE),
        "w2": lin(ks[14], INTERMEDIATE, HIDDEN), "b2": vec(ks[15], HIDDEN),
    }


def pack_layer_params(layer_params, param_dtype=jnp.bfloat16):
    """Stack per-layer params into layer-major slabs for the fused kernel.

    Big weight matrices go to `param_dtype` (bf16 halves weight DMA and hits
    the native MXU bf16 path); small LN params and biases stay f32 (they are
    added to / scale f32 accumulators).
    """
    def stack(fn, dtype):
        return jnp.stack([fn(p) for p in layer_params], axis=0).astype(dtype)

    return dict(
        ln=stack(lambda p: jnp.stack(
            [p["ln1_g"], p["ln1_b"], p["ln2_g"], p["ln2_b"]], axis=0),
            jnp.float32),                                              # (L,4,D)
        wqkv=stack(lambda p: jnp.stack([p["wq"], p["wk"], p["wv"]], axis=0),
                   param_dtype),                                       # (L,3,D,D)
        bqkv=stack(lambda p: jnp.stack(
            [p["bq"][None, :], p["bk"][None, :], p["bv"][None, :]], axis=0),
            jnp.float32),                                              # (L,3,1,D)
        wo=stack(lambda p: p["wo"], param_dtype),                      # (L,D,D)
        bo=stack(lambda p: p["bo"][None, :], jnp.float32),             # (L,1,D)
        w1=stack(lambda p: p["w1"], param_dtype),                      # (L,D,I)
        b1=stack(lambda p: p["b1"][None, :], jnp.float32),             # (L,1,I)
        w2=stack(lambda p: p["w2"], param_dtype),                      # (L,I,D)
        b2=stack(lambda p: p["b2"][None, :], jnp.float32),             # (L,1,D)
    )


# ------------------------- pure-JAX reference (check) ------------------------
def _ref_layer(x, p):
    def ln(v, g, b):
        mu = jnp.mean(v, -1, keepdims=True)
        var = jnp.mean((v - mu) ** 2, -1, keepdims=True)
        return (v - mu) / jnp.sqrt(var + EPS) * g + b

    B, S, D = x.shape
    h = ln(x, p["ln1_g"], p["ln1_b"])
    q = h @ p["wq"] + p["bq"]
    k = h @ p["wk"] + p["bk"]
    v = h @ p["wv"] + p["bv"]
    q = q.reshape(B, S, NUM_HEADS, HEAD_DIM).transpose(0, 2, 1, 3)
    k = k.reshape(B, S, NUM_HEADS, HEAD_DIM).transpose(0, 2, 1, 3)
    v = v.reshape(B, S, NUM_HEADS, HEAD_DIM).transpose(0, 2, 1, 3)
    s = jnp.einsum("bhqd,bhkd->bhqk", q, k) * (HEAD_DIM ** -0.5)
    p_attn = jax.nn.softmax(s, axis=-1)
    o = jnp.einsum("bhqk,bhkd->bhqd", p_attn, v)
    o = o.transpose(0, 2, 1, 3).reshape(B, S, D)
    o = o @ p["wo"] + p["bo"]
    x = x + o
    h2 = ln(x, p["ln2_g"], p["ln2_b"])
    ff = h2 @ p["w1"] + p["b1"]
    ff = 0.5 * ff * (1.0 + jnp.tanh(GELU_C * (ff + 0.044715 * ff ** 3)))
    ff = ff @ p["w2"] + p["b2"]
    return x + ff


def _ref_encoder(x, layer_params):
    for p in layer_params:
        x = _ref_layer(x, p)
    return x


# ----------------------------------- main ------------------------------------
if __name__ == "__main__":
    key = jax.random.PRNGKey(0)
    k_x, *k_layers = jax.random.split(key, 1 + NUM_LAYERS)

    x = jax.random.normal(k_x, (BATCH, SEQ, HIDDEN), jnp.float32)
    layer_params = [init_layer_params(k) for k in k_layers]
    ref = _ref_encoder(x, layer_params)

    # --- exact-math path (f32 weights): tight check vs the PyTorch-equivalent ref
    packed_f32 = pack_layer_params(layer_params, jnp.float32)
    out_f32 = jax.block_until_ready(siglip_encoder(x, packed_f32))
    assert out_f32.shape == (BATCH, SEQ, HIDDEN)
    err32 = float(jnp.max(jnp.abs(out_f32 - ref)))
    assert jnp.allclose(out_f32, ref, atol=2e-3, rtol=2e-3), f"f32 mismatch: {err32}"

    # --- performance path (bf16 weight slabs / MXU operands, f32 accumulation)
    packed_bf16 = pack_layer_params(layer_params, jnp.bfloat16)
    out_bf16 = jax.block_until_ready(siglip_encoder(x, packed_bf16))
    err16 = float(jnp.max(jnp.abs(out_bf16 - ref)))
    assert jnp.allclose(out_bf16, ref, atol=2e-2, rtol=2e-2), f"bf16 mismatch: {err16}"

    print("KERNEL_OK")
</pallas_src>

<mosaic_0001>
module attributes {stable_mosaic.version = 11 : i64} {
  func.func @_encoder_kernel(%arg0: i32, %arg1: memref<16x32xf32, #tpu.memory_space<vmem>>, %arg2: memref<2x4x32xf32, #tpu.memory_space<vmem>>, %arg3: memref<2x3x32x32xf32, #tpu.memory_space<vmem>>, %arg4: memref<2x3x1x32xf32, #tpu.memory_space<vmem>>, %arg5: memref<2x32x32xf32, #tpu.memory_space<vmem>>, %arg6: memref<2x1x32xf32, #tpu.memory_space<vmem>>, %arg7: memref<2x32x64xf32, #tpu.memory_space<vmem>>, %arg8: memref<2x1x64xf32, #tpu.memory_space<vmem>>, %arg9: memref<2x64x32xf32, #tpu.memory_space<vmem>>, %arg10: memref<2x1x32xf32, #tpu.memory_space<vmem>>, %arg11: memref<16x32xf32, #tpu.memory_space<vmem>>) attributes {dimension_semantics = [#tpu.dimension_semantics<parallel>], iteration_bounds = array<i64: 1>, scalar_prefetch = 0 : i64, scratch_operands = 0 : i64, tpu.core_type = #tpu.core_type<tc>, window_params = [{transform_indices = @transform_0, window_bounds = array<i64: 16, 32>}, {pipeline_mode = #tpu.pipeline_mode<synchronous>, transform_indices = @transform_1, window_bounds = array<i64: 2, 4, 32>}, {pipeline_mode = #tpu.pipeline_mode<synchronous>, transform_indices = @transform_2, window_bounds = array<i64: 2, 3, 32, 32>}, {pipeline_mode = #tpu.pipeline_mode<synchronous>, transform_indices = @transform_3, window_bounds = array<i64: 2, 3, 1, 32>}, {pipeline_mode = #tpu.pipeline_mode<synchronous>, transform_indices = @transform_4, window_bounds = array<i64: 2, 32, 32>}, {pipeline_mode = #tpu.pipeline_mode<synchronous>, transform_indices = @transform_5, window_bounds = array<i64: 2, 1, 32>}, {pipeline_mode = #tpu.pipeline_mode<synchronous>, transform_indices = @transform_6, window_bounds = array<i64: 2, 32, 64>}, {pipeline_mode = #tpu.pipeline_mode<synchronous>, transform_indices = @transform_7, window_bounds = array<i64: 2, 1, 64>}, {pipeline_mode = #tpu.pipeline_mode<synchronous>, transform_indices = @transform_8, window_bounds = array<i64: 2, 64, 32>}, {pipeline_mode = #tpu.pipeline_mode<synchronous>, transform_indices = @transform_9, window_bounds = array<i64: 2, 1, 32>}, {transform_indices = @transform_10, window_bounds = array<i64: 16, 32>}]} {
    %c0 = arith.constant 0 : index
    %c0_0 = arith.constant 0 : index
    %0 = vector.load %arg1[%c0, %c0_0] : memref<16x32xf32, #tpu.memory_space<vmem>>, vector<16x32xf32>
    %c0_1 = arith.constant 0 : index
    %c0_2 = arith.constant 0 : index
    %c0_3 = arith.constant 0 : index
    %1 = vector.load %arg2[%c0_1, %c0_2, %c0_3] : memref<2x4x32xf32, #tpu.memory_space<vmem>>, vector<1x4x32xf32>
    %2 = vector.shape_cast %1 : vector<1x4x32xf32> to vector<4x32xf32>
    %3 = vector.extract_strided_slice %2 {offsets = [0, 0], sizes = [1, 32], strides = [1, 1]} : vector<4x32xf32> to vector<1x32xf32>
    %4 = vector.extract_strided_slice %2 {offsets = [1, 0], sizes = [1, 32], strides = [1, 1]} : vector<4x32xf32> to vector<1x32xf32>
    %cst = arith.constant dense<0.000000e+00> : vector<16xf32>
    %5 = vector.multi_reduction <add>, %0, %cst [1] : vector<16x32xf32> to vector<16xf32>
    %6 = vector.shape_cast %5 : vector<16xf32> to vector<16x1xf32>
    %cst_4 = arith.constant 3.200000e+01 : f32
    %7 = vector.broadcast %cst_4 : f32 to vector<16x1xf32>
    %8 = arith.divf %6, %7 : vector<16x1xf32>
    %9 = vector.broadcast %8 : vector<16x1xf32> to vector<16x32xf32>
    %10 = arith.subf %0, %9 : vector<16x32xf32>
    %11 = arith.mulf %10, %10 : vector<16x32xf32>
    %cst_5 = arith.constant dense<0.000000e+00> : vector<16xf32>
    %12 = vector.multi_reduction <add>, %11, %cst_5 [1] : vector<16x32xf32> to vector<16xf32>
    %13 = vector.shape_cast %12 : vector<16xf32> to vector<16x1xf32>
    %cst_6 = arith.constant 3.200000e+01 : f32
    %14 = vector.broadcast %cst_6 : f32 to vector<16x1xf32>
    %15 = arith.divf %13, %14 : vector<16x1xf32>
    %16 = vector.broadcast %8 : vector<16x1xf32> to vector<16x32xf32>
    %17 = arith.subf %0, %16 : vector<16x32xf32>
    %cst_7 = arith.constant 9.99999997E-7 : f32
    %18 = vector.broadcast %cst_7 : f32 to vector<16x1xf32>
    %19 = arith.addf %15, %18 : vector<16x1xf32>
    %20 = math.rsqrt %19 : vector<16x1xf32>
    %21 = vector.broadcast %20 : vector<16x1xf32> to vector<16x32xf32>
    %22 = arith.mulf %17, %21 : vector<16x32xf32>
    %23 = vector.broadcast %3 : vector<1x32xf32> to vector<16x32xf32>
    %24 = arith.mulf %22, %23 : vector<16x32xf32>
    %25 = vector.broadcast %4 : vector<1x32xf32> to vector<16x32xf32>
    %26 = arith.addf %24, %25 : vector<16x32xf32>
    %c0_8 = arith.constant 0 : index
    %c0_9 = arith.constant 0 : index
    %c0_10 = arith.constant 0 : index
    %c0_11 = arith.constant 0 : index
    %27 = vector.load %arg3[%c0_8, %c0_9, %c0_10, %c0_11] : memref<2x3x32x32xf32, #tpu.memory_space<vmem>>, vector<1x1x32x32xf32>
    %28 = vector.shape_cast %27 : vector<1x1x32x32xf32> to vector<32x32xf32>
    %cst_12 = arith.constant dense<0.000000e+00> : vector<16x32xf32>
    %29 = tpu.matmul %26, %28, %cst_12 {dimension_numbers = #tpu.dot_dimension_numbers<[1], [0], [0], [1], [0, 0, 1, 1], [], []>} : vector<16x32xf32>, vector<32x32xf32>, vector<16x32xf32> -> vector<16x32xf32>
    %c0_13 = arith.constant 0 : index
    %c0_14 = arith.constant 0 : index
    %c0_15 = arith.constant 0 : index
    %c0_16 = arith.constant 0 : index
    %30 = vector.load %arg4[%c0_13, %c0_14, %c0_15, %c0_16] : memref<2x3x1x32xf32, #tpu.memory_space<vmem>>, vector<1x1x1x32xf32>
    %31 = vector.shape_cast %30 : vector<1x1x1x32xf32> to vector<1x32xf32>
    %32 = vector.broadcast %31 : vector<1x32xf32> to vector<16x32xf32>
    %33 = arith.addf %29, %32 : vector<16x32xf32>
    %c0_17 = arith.constant 0 : index
    %c1 = arith.constant 1 : index
    %c0_18 = arith.constant 0 : index
    %c0_19 = arith.constant 0 : index
    %34 = vector.load %arg3[%c0_17, %c1, %c0_18, %c0_19] : memref<2x3x32x32xf32, #tpu.memory_space<vmem>>, vector<1x1x32x32xf32>
    %35 = vector.shape_cast %34 : vector<1x1x32x32xf32> to vector<32x32xf32>
    %cst_20 = arith.constant dense<0.000000e+00> : vector<16x32xf32>
    %36 = tpu.matmul %26, %35, %cst_20 {dimension_numbers = #tpu.dot_dimension_numbers<[1], [0], [0], [1], [0, 0, 1, 1], [], []>} : vector<16x32xf32>, vector<32x32xf32>, vector<16x32xf32> -> vector<16x32xf32>
    %c0_21 = arith.constant 0 : index
    %c1_22 = arith.constant 1 : index
    %c0_23 = arith.constant 0 : index
    %c0_24 = arith.constant 0 : index
    %37 = vector.load %arg4[%c0_21, %c1_22, %c0_23, %c0_24] : memref<2x3x1x32xf32, #tpu.memory_space<vmem>>, vector<1x1x1x32xf32>
    %38 = vector.shape_cast %37 : vector<1x1x1x32xf32> to vector<1x32xf32>
    %39 = vector.broadcast %38 : vector<1x32xf32> to vector<16x32xf32>
    %40 = arith.addf %36, %39 : vector<16x32xf32>
    %c0_25 = arith.constant 0 : index
    %c2 = arith.constant 2 : index
    %c0_26 = arith.constant 0 : index
    %c0_27 = arith.constant 0 : index
    %41 = vector.load %arg3[%c0_25, %c2, %c0_26, %c0_27] : memref<2x3x32x32xf32, #tpu.memory_space<vmem>>, vector<1x1x32x32xf32>
    %42 = vector.shape_cast %41 : vector<1x1x32x32xf32> to vector<32x32xf32>
    %cst_28 = arith.constant dense<0.000000e+00> : vector<16x32xf32>
    %43 = tpu.matmul %26, %42, %cst_28 {dimension_numbers = #tpu.dot_dimension_numbers<[1], [0], [0], [1], [0, 0, 1, 1], [], []>} : vector<16x32xf32>, vector<32x32xf32>, vector<16x32xf32> -> vector<16x32xf32>
    %c0_29 = arith.constant 0 : index
    %c2_30 = arith.constant 2 : index
    %c0_31 = arith.constant 0 : index
    %c0_32 = arith.constant 0 : index
    %44 = vector.load %arg4[%c0_29, %c2_30, %c0_31, %c0_32] : memref<2x3x1x32xf32, #tpu.memory_space<vmem>>, vector<1x1x1x32xf32>
    %45 = vector.shape_cast %44 : vector<1x1x1x32xf32> to vector<1x32xf32>
    %46 = vector.broadcast %45 : vector<1x32xf32> to vector<16x32xf32>
    %47 = arith.addf %43, %46 : vector<16x32xf32>
    %48 = tpu.concatenate %33, %40, %47 in 0 : vector<16x32xf32>, vector<16x32xf32>, vector<16x32xf32> -> vector<48x32xf32>
    %49 = vector.extract_strided_slice %48 {offsets = [0, 0], sizes = [48, 8], strides = [1, 1]} : vector<48x32xf32> to vector<48x8xf32>
    %50 = vector.extract_strided_slice %48 {offsets = [0, 8], sizes = [48, 8], strides = [1, 1]} : vector<48x32xf32> to vector<48x8xf32>
    %51 = vector.extract_strided_slice %48 {offsets = [0, 16], sizes = [48, 8], strides = [1, 1]} : vector<48x32xf32> to vector<48x8xf32>
    %52 = vector.extract_strided_slice %48 {offsets = [0, 24], sizes = [48, 8], strides = [1, 1]} : vector<48x32xf32> to vector<48x8xf32>
    %53 = tpu.concatenate %49, %50, %51, %52 in 0 : vector<48x8xf32>, vector<48x8xf32>, vector<48x8xf32>, vector<48x8xf32> -> vector<192x8xf32>
    %54 = vector.shape_cast %53 : vector<192x8xf32> to vector<4x3x2x8x8xf32>
    %55 = vector.extract_strided_slice %54 {offsets = [0, 0, 0, 0, 0], sizes = [4, 1, 2, 8, 8], strides = [1, 1, 1, 1, 1]} : vector<4x3x2x8x8xf32> to vector<4x1x2x8x8xf32>
    %56 = vector.shape_cast %55 : vector<4x1x2x8x8xf32> to vector<4x2x8x8xf32>
    %57 = vector.shape_cast %56 : vector<4x2x8x8xf32> to vector<8x8x8xf32>
    %58 = vector.extract_strided_slice %54 {offsets = [0, 1, 0, 0, 0], sizes = [4, 1, 2, 8, 8], strides = [1, 1, 1, 1, 1]} : vector<4x3x2x8x8xf32> to vector<4x1x2x8x8xf32>
    %59 = vector.shape_cast %58 : vector<4x1x2x8x8xf32> to vector<4x2x8x8xf32>
    %60 = vector.shape_cast %59 : vector<4x2x8x8xf32> to vector<8x8x8xf32>
    %61 = vector.extract_strided_slice %54 {offsets = [0, 2, 0, 0, 0], sizes = [4, 1, 2, 8, 8], strides = [1, 1, 1, 1, 1]} : vector<4x3x2x8x8xf32> to vector<4x1x2x8x8xf32>
    %62 = vector.shape_cast %61 : vector<4x1x2x8x8xf32> to vector<4x2x8x8xf32>
    %63 = vector.shape_cast %62 : vector<4x2x8x8xf32> to vector<8x8x8xf32>
    "tpu.trace_start"() <{level = 10 : i32, message = "bqd,bkd->bqk"}> : () -> ()
    %cst_33 = arith.constant dense<0.000000e+00> : vector<8x8x8xf32>
    %64 = tpu.matmul %57, %60, %cst_33 {dimension_numbers = #tpu.dot_dimension_numbers<[2], [2], [1], [1], [0, 0, 0, 1, 1, 1], [0], [0]>} : vector<8x8x8xf32>, vector<8x8x8xf32>, vector<8x8x8xf32> -> vector<8x8x8xf32>
    "tpu.trace_stop"() : () -> ()
    %cst_34 = arith.constant 0.353553385 : f32
    %65 = vector.broadcast %cst_34 : f32 to vector<8x8x8xf32>
    %66 = arith.mulf %64, %65 : vector<8x8x8xf32>
    %cst_35 = arith.constant dense<0xFF800000> : vector<8x8xf32>
    %67 = vector.multi_reduction <maximumf>, %66, %cst_35 [2] : vector<8x8x8xf32> to vector<8x8xf32>
    %68 = vector.shape_cast %67 : vector<8x8xf32> to vector<8x8x1xf32>
    %69 = vector.broadcast %68 : vector<8x8x1xf32> to vector<8x8x8xf32>
    %70 = arith.subf %66, %69 : vector<8x8x8xf32>
    %71 = math.exp %70 : vector<8x8x8xf32>
    %cst_36 = arith.constant dense<0.000000e+00> : vector<8x8xf32>
    %72 = vector.multi_reduction <add>, %71, %cst_36 [2] : vector<8x8x8xf32> to vector<8x8xf32>
    %73 = vector.shape_cast %72 : vector<8x8xf32> to vector<8x8x1xf32>
    %74 = tpu.reciprocal %73 {approx = true} : vector<8x8x1xf32> -> vector<8x8x1xf32>
    %75 = vector.broadcast %74 : vector<8x8x1xf32> to vector<8x8x8xf32>
    %76 = arith.mulf %71, %75 : vector<8x8x8xf32>
    "tpu.trace_start"() <{level = 10 : i32, message = "bqk,bkd->bqd"}> : () -> ()
    %cst_37 = arith.constant dense<0.000000e+00> : vector<8x8x8xf32>
    %77 = tpu.matmul %76, %63, %cst_37 {dimension_numbers = #tpu.dot_dimension_numbers<[2], [1], [1], [2], [0, 0, 0, 1, 1, 2], [0], [0]>} : vector<8x8x8xf32>, vector<8x8x8xf32>, vector<8x8x8xf32> -> vector<8x8x8xf32>
    "tpu.trace_stop"() : () -> ()
    %78 = vector.shape_cast %77 : vector<8x8x8xf32> to vector<4x16x8xf32>
    %79 = vector.extract_strided_slice %78 {offsets = [0, 0, 0], sizes = [1, 16, 8], strides = [1, 1, 1]} : vector<4x16x8xf32> to vector<1x16x8xf32>
    %80 = vector.shape_cast %79 : vector<1x16x8xf32> to vector<16x8xf32>
    %81 = vector.extract_strided_slice %78 {offsets = [1, 0, 0], sizes = [1, 16, 8], strides = [1, 1, 1]} : vector<4x16x8xf32> to vector<1x16x8xf32>
    %82 = vector.shape_cast %81 : vector<1x16x8xf32> to vector<16x8xf32>
    %83 = vector.extract_strided_slice %78 {offsets = [2, 0, 0], sizes = [1, 16, 8], strides = [1, 1, 1]} : vector<4x16x8xf32> to vector<1x16x8xf32>
    %84 = vector.shape_cast %83 : vector<1x16x8xf32> to vector<16x8xf32>
    %85 = vector.extract_strided_slice %78 {offsets = [3, 0, 0], sizes = [1, 16, 8], strides = [1, 1, 1]} : vector<4x16x8xf32> to vector<1x16x8xf32>
    %86 = vector.shape_cast %85 : vector<1x16x8xf32> to vector<16x8xf32>
    %87 = tpu.concatenate %80, %82, %84, %86 in 1 : vector<16x8xf32>, vector<16x8xf32>, vector<16x8xf32>, vector<16x8xf32> -> vector<16x32xf32>
    %c0_38 = arith.constant 0 : index
    %c0_39 = arith.constant 0 : index
    %c0_40 = arith.constant 0 : index
    %88 = vector.load %arg5[%c0_38, %c0_39, %c0_40] : memref<2x32x32xf32, #tpu.memory_space<vmem>>, vector<1x32x32xf32>
    %89 = vector.shape_cast %88 : vector<1x32x32xf32> to vector<32x32xf32>
    %cst_41 = arith.constant dense<0.000000e+00> : vector<16x32xf32>
    %90 = tpu.matmul %87, %89, %cst_41 {dimension_numbers = #tpu.dot_dimension_numbers<[1], [0], [0], [1], [0, 0, 1, 1], [], []>} : vector<16x32xf32>, vector<32x32xf32>, vector<16x32xf32> -> vector<16x32xf32>
    %c0_42 = arith.constant 0 : index
    %c0_43 = arith.constant 0 : index
    %c0_44 = arith.constant 0 : index
    %91 = vector.load %arg6[%c0_42, %c0_43, %c0_44] : memref<2x1x32xf32, #tpu.memory_space<vmem>>, vector<1x1x32xf32>
    %92 = vector.shape_cast %91 : vector<1x1x32xf32> to vector<1x32xf32>
    %93 = vector.broadcast %92 : vector<1x32xf32> to vector<16x32xf32>
    %94 = arith.addf %90, %93 : vector<16x32xf32>
    %95 = arith.addf %0, %94 : vector<16x32xf32>
    %96 = vector.extract_strided_slice %2 {offsets = [2, 0], sizes = [1, 32], strides = [1, 1]} : vector<4x32xf32> to vector<1x32xf32>
    %97 = vector.extract_strided_slice %2 {offsets = [3, 0], sizes = [1, 32], strides = [1, 1]} : vector<4x32xf32> to vector<1x32xf32>
    %cst_45 = arith.constant dense<0.000000e+00> : vector<16xf32>
    %98 = vector.multi_reduction <add>, %95, %cst_45 [1] : vector<16x32xf32> to vector<16xf32>
    %99 = vector.shape_cast %98 : vector<16xf32> to vector<16x1xf32>
    %cst_46 = arith.constant 3.200000e+01 : f32
    %100 = vector.broadcast %cst_46 : f32 to vector<16x1xf32>
    %101 = arith.divf %99, %100 : vector<16x1xf32>
    %102 = vector.broadcast %101 : vector<16x1xf32> to vector<16x32xf32>
    %103 = arith.subf %95, %102 : vector<16x32xf32>
    %104 = arith.mulf %103, %103 : vector<16x32xf32>
    %cst_47 = arith.constant dense<0.000000e+00> : vector<16xf32>
    %105 = vector.multi_reduction <add>, %104, %cst_47 [1] : vector<16x32xf32> to vector<16xf32>
    %106 = vector.shape_cast %105 : vector<16xf32> to vector<16x1xf32>
    %cst_48 = arith.constant 3.200000e+01 : f32
    %107 = vector.broadcast %cst_48 : f32 to vector<16x1xf32>
    %108 = arith.divf %106, %107 : vector<16x1xf32>
    %109 = vector.broadcast %101 : vector<16x1xf32> to vector<16x32xf32>
    %110 = arith.subf %95, %109 : vector<16x32xf32>
    %cst_49 = arith.constant 9.99999997E-7 : f32
    %111 = vector.broadcast %cst_49 : f32 to vector<16x1xf32>
    %112 = arith.addf %108, %111 : vector<16x1xf32>
    %113 = math.rsqrt %112 : vector<16x1xf32>
    %114 = vector.broadcast %113 : vector<16x1xf32> to vector<16x32xf32>
    %115 = arith.mulf %110, %114 : vector<16x32xf32>
    %116 = vector.broadcast %96 : vector<1x32xf32> to vector<16x32xf32>
    %117 = arith.mulf %115, %116 : vector<16x32xf32>
    %118 = vector.broadcast %97 : vector<1x32xf32> to vector<16x32xf32>
    %119 = arith.addf %117, %118 : vector<16x32xf32>
    %c0_50 = arith.constant 0 : index
    %c0_51 = arith.constant 0 : index
    %c0_52 = arith.constant 0 : index
    %120 = vector.load %arg7[%c0_50, %c0_51, %c0_52] : memref<2x32x64xf32, #tpu.memory_space<vmem>>, vector<1x32x64xf32>
    %121 = vector.shape_cast %120 : vector<1x32x64xf32> to vector<32x64xf32>
    %cst_53 = arith.constant dense<0.000000e+00> : vector<16x64xf32>
    %122 = tpu.matmul %119, %121, %cst_53 {dimension_numbers = #tpu.dot_dimension_numbers<[1], [0], [0], [1], [0, 0, 1, 1], [], []>} : vector<16x32xf32>, vector<32x64xf32>, vector<16x64xf32> -> vector<16x64xf32>
    %c0_54 = arith.constant 0 : index
    %c0_55 = arith.constant 0 : index
    %c0_56 = arith.constant 0 : index
    %123 = vector.load %arg8[%c0_54, %c0_55, %c0_56] : memref<2x1x64xf32, #tpu.memory_space<vmem>>, vector<1x1x64xf32>
    %124 = vector.shape_cast %123 : vector<1x1x64xf32> to vector<1x64xf32>
    %125 = vector.broadcast %124 : vector<1x64xf32> to vector<16x64xf32>
    %126 = arith.addf %122, %125 : vector<16x64xf32>
    %cst_57 = arith.constant 5.000000e-01 : f32
    %127 = vector.broadcast %cst_57 : f32 to vector<16x64xf32>
    %128 = arith.mulf %127, %126 : vector<16x64xf32>
    %cst_58 = arith.constant 4.471500e-02 : f32
    %129 = vector.broadcast %cst_58 : f32 to vector<16x64xf32>
    %130 = arith.mulf %129, %126 : vector<16x64xf32>
    %131 = arith.mulf %130, %126 : vector<16x64xf32>
    %132 = arith.mulf %131, %126 : vector<16x64xf32>
    %133 = arith.addf %126, %132 : vector<16x64xf32>
    %cst_59 = arith.constant 0.797884583 : f32
    %134 = vector.broadcast %cst_59 : f32 to vector<16x64xf32>
    %135 = arith.mulf %134, %133 : vector<16x64xf32>
    %136 = math.tanh %135 : vector<16x64xf32>
    %cst_60 = arith.constant 1.000000e+00 : f32
    %137 = vector.broadcast %cst_60 : f32 to vector<16x64xf32>
    %138 = arith.addf %137, %136 : vector<16x64xf32>
    %139 = arith.mulf %128, %138 : vector<16x64xf32>
    %c0_61 = arith.constant 0 : index
    %c0_62 = arith.constant 0 : index
    %c0_63 = arith.constant 0 : index
    %140 = vector.load %arg9[%c0_61, %c0_62, %c0_63] : memref<2x64x32xf32, #tpu.memory_space<vmem>>, vector<1x64x32xf32>
    %141 = vector.shape_cast %140 : vector<1x64x32xf32> to vector<64x32xf32>
    %cst_64 = arith.constant dense<0.000000e+00> : vector<16x32xf32>
    %142 = tpu.matmul %139, %141, %cst_64 {dimension_numbers = #tpu.dot_dimension_numbers<[1], [0], [0], [1], [0, 0, 1, 1], [], []>} : vector<16x64xf32>, vector<64x32xf32>, vector<16x32xf32> -> vector<16x32xf32>
    %c0_65 = arith.constant 0 : index
    %c0_66 = arith.constant 0 : index
    %c0_67 = arith.constant 0 : index
    %143 = vector.load %arg10[%c0_65, %c0_66, %c0_67] : memref<2x1x32xf32, #tpu.memory_space<vmem>>, vector<1x1x32xf32>
    %144 = vector.shape_cast %143 : vector<1x1x32xf32> to vector<1x32xf32>
    %145 = vector.broadcast %144 : vector<1x32xf32> to vector<16x32xf32>
    %146 = arith.addf %142, %145 : vector<16x32xf32>
    %147 = arith.addf %95, %146 : vector<16x32xf32>
    %c1_68 = arith.constant 1 : index
    %c0_69 = arith.constant 0 : index
    %c0_70 = arith.constant 0 : index
    %148 = vector.load %arg2[%c1_68, %c0_69, %c0_70] : memref<2x4x32xf32, #tpu.memory_space<vmem>>, vector<1x4x32xf32>
    %149 = vector.shape_cast %148 : vector<1x4x32xf32> to vector<4x32xf32>
    %150 = vector.extract_strided_slice %149 {offsets = [0, 0], sizes = [1, 32], strides = [1, 1]} : vector<4x32xf32> to vector<1x32xf32>
    %151 = vector.extract_strided_slice %149 {offsets = [1, 0], sizes = [1, 32], strides = [1, 1]} : vector<4x32xf32> to vector<1x32xf32>
    %cst_71 = arith.constant dense<0.000000e+00> : vector<16xf32>
    %152 = vector.multi_reduction <add>, %147, %cst_71 [1] : vector<16x32xf32> to vector<16xf32>
    %153 = vector.shape_cast %152 : vector<16xf32> to vector<16x1xf32>
    %cst_72 = arith.constant 3.200000e+01 : f32
    %154 = vector.broadcast %cst_72 : f32 to vector<16x1xf32>
    %155 = arith.divf %153, %154 : vector<16x1xf32>
    %156 = vector.broadcast %155 : vector<16x1xf32> to vector<16x32xf32>
    %157 = arith.subf %147, %156 : vector<16x32xf32>
    %158 = arith.mulf %157, %157 : vector<16x32xf32>
    %cst_73 = arith.constant dense<0.000000e+00> : vector<16xf32>
    %159 = vector.multi_reduction <add>, %158, %cst_73 [1] : vector<16x32xf32> to vector<16xf32>
    %160 = vector.shape_cast %159 : vector<16xf32> to vector<16x1xf32>
    %cst_74 = arith.constant 3.200000e+01 : f32
    %161 = vector.broadcast %cst_74 : f32 to vector<16x1xf32>
    %162 = arith.divf %160, %161 : vector<16x1xf32>
    %163 = vector.broadcast %155 : vector<16x1xf32> to vector<16x32xf32>
    %164 = arith.subf %147, %163 : vector<16x32xf32>
    %cst_75 = arith.constant 9.99999997E-7 : f32
    %165 = vector.broadcast %cst_75 : f32 to vector<16x1xf32>
    %166 = arith.addf %162, %165 : vector<16x1xf32>
    %167 = math.rsqrt %166 : vector<16x1xf32>
    %168 = vector.broadcast %167 : vector<16x1xf32> to vector<16x32xf32>
    %169 = arith.mulf %164, %168 : vector<16x32xf32>
    %170 = vector.broadcast %150 : vector<1x32xf32> to vector<16x32xf32>
    %171 = arith.mulf %169, %170 : vector<16x32xf32>
    %172 = vector.broadcast %151 : vector<1x32xf32> to vector<16x32xf32>
    %173 = arith.addf %171, %172 : vector<16x32xf32>
    %c1_76 = arith.constant 1 : index
    %c0_77 = arith.constant 0 : index
    %c0_78 = arith.constant 0 : index
    %c0_79 = arith.constant 0 : index
    %174 = vector.load %arg3[%c1_76, %c0_77, %c0_78, %c0_79] : memref<2x3x32x32xf32, #tpu.memory_space<vmem>>, vector<1x1x32x32xf32>
    %175 = vector.shape_cast %174 : vector<1x1x32x32xf32> to vector<32x32xf32>
    %cst_80 = arith.constant dense<0.000000e+00> : vector<16x32xf32>
    %176 = tpu.matmul %173, %175, %cst_80 {dimension_numbers = #tpu.dot_dimension_numbers<[1], [0], [0], [1], [0, 0, 1, 1], [], []>} : vector<16x32xf32>, vector<32x32xf32>, vector<16x32xf32> -> vector<16x32xf32>
    %c1_81 = arith.constant 1 : index
    %c0_82 = arith.constant 0 : index
    %c0_83 = arith.constant 0 : index
    %c0_84 = arith.constant 0 : index
    %177 = vector.load %arg4[%c1_81, %c0_82, %c0_83, %c0_84] : memref<2x3x1x32xf32, #tpu.memory_space<vmem>>, vector<1x1x1x32xf32>
    %178 = vector.shape_cast %177 : vector<1x1x1x32xf32> to vector<1x32xf32>
    %179 = vector.broadcast %178 : vector<1x32xf32> to vector<16x32xf32>
    %180 = arith.addf %176, %179 : vector<16x32xf32>
    %c1_85 = arith.constant 1 : index
    %c1_86 = arith.constant 1 : index
    %c0_87 = arith.constant 0 : index
    %c0_88 = arith.constant 0 : index
    %181 = vector.load %arg3[%c1_85, %c1_86, %c0_87, %c0_88] : memref<2x3x32x32xf32, #tpu.memory_space<vmem>>, vector<1x1x32x32xf32>
    %182 = vector.shape_cast %181 : vector<1x1x32x32xf32> to vector<32x32xf32>
    %cst_89 = arith.constant dense<0.000000e+00> : vector<16x32xf32>
    %183 = tpu.matmul %173, %182, %cst_89 {dimension_numbers = #tpu.dot_dimension_numbers<[1], [0], [0], [1], [0, 0, 1, 1], [], []>} : vector<16x32xf32>, vector<32x32xf32>, vector<16x32xf32> -> vector<16x32xf32>
    %c1_90 = arith.constant 1 : index
    %c1_91 = arith.constant 1 : index
    %c0_92 = arith.constant 0 : index
    %c0_93 = arith.constant 0 : index
    %184 = vector.load %arg4[%c1_90, %c1_91, %c0_92, %c0_93] : memref<2x3x1x32xf32, #tpu.memory_space<vmem>>, vector<1x1x1x32xf32>
    %185 = vector.shape_cast %184 : vector<1x1x1x32xf32> to vector<1x32xf32>
    %186 = vector.broadcast %185 : vector<1x32xf32> to vector<16x32xf32>
    %187 = arith.addf %183, %186 : vector<16x32xf32>
    %c1_94 = arith.constant 1 : index
    %c2_95 = arith.constant 2 : index
    %c0_96 = arith.constant 0 : index
    %c0_97 = arith.constant 0 : index
    %188 = vector.load %arg3[%c1_94, %c2_95, %c0_96, %c0_97] : memref<2x3x32x32xf32, #tpu.memory_space<vmem>>, vector<1x1x32x32xf32>
    %189 = vector.shape_cast %188 : vector<1x1x32x32xf32> to vector<32x32xf32>
    %cst_98 = arith.constant dense<0.000000e+00> : vector<16x32xf32>
    %190 = tpu.matmul %173, %189, %cst_98 {dimension_numbers = #tpu.dot_dimension_numbers<[1], [0], [0], [1], [0, 0, 1, 1], [], []>} : vector<16x32xf32>, vector<32x32xf32>, vector<16x32xf32> -> vector<16x32xf32>
    %c1_99 = arith.constant 1 : index
    %c2_100 = arith.constant 2 : index
    %c0_101 = arith.constant 0 : index
    %c0_102 = arith.constant 0 : index
    %191 = vector.load %arg4[%c1_99, %c2_100, %c0_101, %c0_102] : memref<2x3x1x32xf32, #tpu.memory_space<vmem>>, vector<1x1x1x32xf32>
    %192 = vector.shape_cast %191 : vector<1x1x1x32xf32> to vector<1x32xf32>
    %193 = vector.broadcast %192 : vector<1x32xf32> to vector<16x32xf32>
    %194 = arith.addf %190, %193 : vector<16x32xf32>
    %195 = tpu.concatenate %180, %187, %194 in 0 : vector<16x32xf32>, vector<16x32xf32>, vector<16x32xf32> -> vector<48x32xf32>
    %196 = vector.extract_strided_slice %195 {offsets = [0, 0], sizes = [48, 8], strides = [1, 1]} : vector<48x32xf32> to vector<48x8xf32>
    %197 = vector.extract_strided_slice %195 {offsets = [0, 8], sizes = [48, 8], strides = [1, 1]} : vector<48x32xf32> to vector<48x8xf32>
    %198 = vector.extract_strided_slice %195 {offsets = [0, 16], sizes = [48, 8], strides = [1, 1]} : vector<48x32xf32> to vector<48x8xf32>
    %199 = vector.extract_strided_slice %195 {offsets = [0, 24], sizes = [48, 8], strides = [1, 1]} : vector<48x32xf32> to vector<48x8xf32>
    %200 = tpu.concatenate %196, %197, %198, %199 in 0 : vector<48x8xf32>, vector<48x8xf32>, vector<48x8xf32>, vector<48x8xf32> -> vector<192x8xf32>
    %201 = vector.shape_cast %200 : vector<192x8xf32> to vector<4x3x2x8x8xf32>
    %202 = vector.extract_strided_slice %201 {offsets = [0, 0, 0, 0, 0], sizes = [4, 1, 2, 8, 8], strides = [1, 1, 1, 1, 1]} : vector<4x3x2x8x8xf32> to vector<4x1x2x8x8xf32>
    %203 = vector.shape_cast %202 : vector<4x1x2x8x8xf32> to vector<4x2x8x8xf32>
    %204 = vector.shape_cast %203 : vector<4x2x8x8xf32> to vector<8x8x8xf32>
    %205 = vector.extract_strided_slice %201 {offsets = [0, 1, 0, 0, 0], sizes = [4, 1, 2, 8, 8], strides = [1, 1, 1, 1, 1]} : vector<4x3x2x8x8xf32> to vector<4x1x2x8x8xf32>
    %206 = vector.shape_cast %205 : vector<4x1x2x8x8xf32> to vector<4x2x8x8xf32>
    %207 = vector.shape_cast %206 : vector<4x2x8x8xf32> to vector<8x8x8xf32>
    %208 = vector.extract_strided_slice %201 {offsets = [0, 2, 0, 0, 0], sizes = [4, 1, 2, 8, 8], strides = [1, 1, 1, 1, 1]} : vector<4x3x2x8x8xf32> to vector<4x1x2x8x8xf32>
    %209 = vector.shape_cast %208 : vector<4x1x2x8x8xf32> to vector<4x2x8x8xf32>
    %210 = vector.shape_cast %209 : vector<4x2x8x8xf32> to vector<8x8x8xf32>
    "tpu.trace_start"() <{level = 10 : i32, message = "bqd,bkd->bqk"}> : () -> ()
    %cst_103 = arith.constant dense<0.000000e+00> : vector<8x8x8xf32>
    %211 = tpu.matmul %204, %207, %cst_103 {dimension_numbers = #tpu.dot_dimension_numbers<[2], [2], [1], [1], [0, 0, 0, 1, 1, 1], [0], [0]>} : vector<8x8x8xf32>, vector<8x8x8xf32>, vector<8x8x8xf32> -> vector<8x8x8xf32>
    "tpu.trace_stop"() : () -> ()
    %cst_104 = arith.constant 0.353553385 : f32
    %212 = vector.broadcast %cst_104 : f32 to vector<8x8x8xf32>
    %213 = arith.mulf %211, %212 : vector<8x8x8xf32>
    %cst_105 = arith.constant dense<0xFF800000> : vector<8x8xf32>
    %214 = vector.multi_reduction <maximumf>, %213, %cst_105 [2] : vector<8x8x8xf32> to vector<8x8xf32>
    %215 = vector.shape_cast %214 : vector<8x8xf32> to vector<8x8x1xf32>
    %216 = vector.broadcast %215 : vector<8x8x1xf32> to vector<8x8x8xf32>
    %217 = arith.subf %213, %216 : vector<8x8x8xf32>
    %218 = math.exp %217 : vector<8x8x8xf32>
    %cst_106 = arith.constant dense<0.000000e+00> : vector<8x8xf32>
    %219 = vector.multi_reduction <add>, %218, %cst_106 [2] : vector<8x8x8xf32> to vector<8x8xf32>
    %220 = vector.shape_cast %219 : vector<8x8xf32> to vector<8x8x1xf32>
    %221 = tpu.reciprocal %220 {approx = true} : vector<8x8x1xf32> -> vector<8x8x1xf32>
    %222 = vector.broadcast %221 : vector<8x8x1xf32> to vector<8x8x8xf32>
    %223 = arith.mulf %218, %222 : vector<8x8x8xf32>
    "tpu.trace_start"() <{level = 10 : i32, message = "bqk,bkd->bqd"}> : () -> ()
    %cst_107 = arith.constant dense<0.000000e+00> : vector<8x8x8xf32>
    %224 = tpu.matmul %223, %210, %cst_107 {dimension_numbers = #tpu.dot_dimension_numbers<[2], [1], [1], [2], [0, 0, 0, 1, 1, 2], [0], [0]>} : vector<8x8x8xf32>, vector<8x8x8xf32>, vector<8x8x8xf32> -> vector<8x8x8xf32>
    "tpu.trace_stop"() : () -> ()
    %225 = vector.shape_cast %224 : vector<8x8x8xf32> to vector<4x16x8xf32>
    %226 = vector.extract_strided_slice %225 {offsets = [0, 0, 0], sizes = [1, 16, 8], strides = [1, 1, 1]} : vector<4x16x8xf32> to vector<1x16x8xf32>
    %227 = vector.shape_cast %226 : vector<1x16x8xf32> to vector<16x8xf32>
    %228 = vector.extract_strided_slice %225 {offsets = [1, 0, 0], sizes = [1, 16, 8], strides = [1, 1, 1]} : vector<4x16x8xf32> to vector<1x16x8xf32>
    %229 = vector.shape_cast %228 : vector<1x16x8xf32> to vector<16x8xf32>
    %230 = vector.extract_strided_slice %225 {offsets = [2, 0, 0], sizes = [1, 16, 8], strides = [1, 1, 1]} : vector<4x16x8xf32> to vector<1x16x8xf32>
    %231 = vector.shape_cast %230 : vector<1x16x8xf32> to vector<16x8xf32>
    %232 = vector.extract_strided_slice %225 {offsets = [3, 0, 0], sizes = [1, 16, 8], strides = [1, 1, 1]} : vector<4x16x8xf32> to vector<1x16x8xf32>
    %233 = vector.shape_cast %232 : vector<1x16x8xf32> to vector<16x8xf32>
    %234 = tpu.concatenate %227, %229, %231, %233 in 1 : vector<16x8xf32>, vector<16x8xf32>, vector<16x8xf32>, vector<16x8xf32> -> vector<16x32xf32>
    %c1_108 = arith.constant 1 : index
    %c0_109 = arith.constant 0 : index
    %c0_110 = arith.constant 0 : index
    %235 = vector.load %arg5[%c1_108, %c0_109, %c0_110] : memref<2x32x32xf32, #tpu.memory_space<vmem>>, vector<1x32x32xf32>
    %236 = vector.shape_cast %235 : vector<1x32x32xf32> to vector<32x32xf32>
    %cst_111 = arith.constant dense<0.000000e+00> : vector<16x32xf32>
    %237 = tpu.matmul %234, %236, %cst_111 {dimension_numbers = #tpu.dot_dimension_numbers<[1], [0], [0], [1], [0, 0, 1, 1], [], []>} : vector<16x32xf32>, vector<32x32xf32>, vector<16x32xf32> -> vector<16x32xf32>
    %c1_112 = arith.constant 1 : index
    %c0_113 = arith.constant 0 : index
    %c0_114 = arith.constant 0 : index
    %238 = vector.load %arg6[%c1_112, %c0_113, %c0_114] : memref<2x1x32xf32, #tpu.memory_space<vmem>>, vector<1x1x32xf32>
    %239 = vector.shape_cast %238 : vector<1x1x32xf32> to vector<1x32xf32>
    %240 = vector.broadcast %239 : vector<1x32xf32> to vector<16x32xf32>
    %241 = arith.addf %237, %240 : vector<16x32xf32>
    %242 = arith.addf %147, %241 : vector<16x32xf32>
    %243 = vector.extract_strided_slice %149 {offsets = [2, 0], sizes = [1, 32], strides = [1, 1]} : vector<4x32xf32> to vector<1x32xf32>
    %244 = vector.extract_strided_slice %149 {offsets = [3, 0], sizes = [1, 32], strides = [1, 1]} : vector<4x32xf32> to vector<1x32xf32>
    %cst_115 = arith.constant dense<0.000000e+00> : vector<16xf32>
    %245 = vector.multi_reduction <add>, %242, %cst_115 [1] : vector<16x32xf32> to vector<16xf32>
    %246 = vector.shape_cast %245 : vector<16xf32> to vector<16x1xf32>
    %cst_116 = arith.constant 3.200000e+01 : f32
    %247 = vector.broadcast %cst_116 : f32 to vector<16x1xf32>
    %248 = arith.divf %246, %247 : vector<16x1xf32>
    %249 = vector.broadcast %248 : vector<16x1xf32> to vector<16x32xf32>
    %250 = arith.subf %242, %249 : vector<16x32xf32>
    %251 = arith.mulf %250, %250 : vector<16x32xf32>
    %cst_117 = arith.constant dense<0.000000e+00> : vector<16xf32>
    %252 = vector.multi_reduction <add>, %251, %cst_117 [1] : vector<16x32xf32> to vector<16xf32>
    %253 = vector.shape_cast %252 : vector<16xf32> to vector<16x1xf32>
    %cst_118 = arith.constant 3.200000e+01 : f32
    %254 = vector.broadcast %cst_118 : f32 to vector<16x1xf32>
    %255 = arith.divf %253, %254 : vector<16x1xf32>
    %256 = vector.broadcast %248 : vector<16x1xf32> to vector<16x32xf32>
    %257 = arith.subf %242, %256 : vector<16x32xf32>
    %cst_119 = arith.constant 9.99999997E-7 : f32
    %258 = vector.broadcast %cst_119 : f32 to vector<16x1xf32>
    %259 = arith.addf %255, %258 : vector<16x1xf32>
    %260 = math.rsqrt %259 : vector<16x1xf32>
    %261 = vector.broadcast %260 : vector<16x1xf32> to vector<16x32xf32>
    %262 = arith.mulf %257, %261 : vector<16x32xf32>
    %263 = vector.broadcast %243 : vector<1x32xf32> to vector<16x32xf32>
    %264 = arith.mulf %262, %263 : vector<16x32xf32>
    %265 = vector.broadcast %244 : vector<1x32xf32> to vector<16x32xf32>
    %266 = arith.addf %264, %265 : vector<16x32xf32>
    %c1_120 = arith.constant 1 : index
    %c0_121 = arith.constant 0 : index
    %c0_122 = arith.constant 0 : index
    %267 = vector.load %arg7[%c1_120, %c0_121, %c0_122] : memref<2x32x64xf32, #tpu.memory_space<vmem>>, vector<1x32x64xf32>
    %268 = vector.shape_cast %267 : vector<1x32x64xf32> to vector<32x64xf32>
    %cst_123 = arith.constant dense<0.000000e+00> : vector<16x64xf32>
    %269 = tpu.matmul %266, %268, %cst_123 {dimension_numbers = #tpu.dot_dimension_numbers<[1], [0], [0], [1], [0, 0, 1, 1], [], []>} : vector<16x32xf32>, vector<32x64xf32>, vector<16x64xf32> -> vector<16x64xf32>
    %c1_124 = arith.constant 1 : index
    %c0_125 = arith.constant 0 : index
    %c0_126 = arith.constant 0 : index
    %270 = vector.load %arg8[%c1_124, %c0_125, %c0_126] : memref<2x1x64xf32, #tpu.memory_space<vmem>>, vector<1x1x64xf32>
    %271 = vector.shape_cast %270 : vector<1x1x64xf32> to vector<1x64xf32>
    %272 = vector.broadcast %271 : vector<1x64xf32> to vector<16x64xf32>
    %273 = arith.addf %269, %272 : vector<16x64xf32>
    %cst_127 = arith.constant 5.000000e-01 : f32
    %274 = vector.broadcast %cst_127 : f32 to vector<16x64xf32>
    %275 = arith.mulf %274, %273 : vector<16x64xf32>
    %cst_128 = arith.constant 4.471500e-02 : f32
    %276 = vector.broadcast %cst_128 : f32 to vector<16x64xf32>
    %277 = arith.mulf %276, %273 : vector<16x64xf32>
    %278 = arith.mulf %277, %273 : vector<16x64xf32>
    %279 = arith.mulf %278, %273 : vector<16x64xf32>
    %280 = arith.addf %273, %279 : vector<16x64xf32>
    %cst_129 = arith.constant 0.797884583 : f32
    %281 = vector.broadcast %cst_129 : f32 to vector<16x64xf32>
    %282 = arith.mulf %281, %280 : vector<16x64xf32>
    %283 = math.tanh %282 : vector<16x64xf32>
    %cst_130 = arith.constant 1.000000e+00 : f32
    %284 = vector.broadcast %cst_130 : f32 to vector<16x64xf32>
    %285 = arith.addf %284, %283 : vector<16x64xf32>
    %286 = arith.mulf %275, %285 : vector<16x64xf32>
    %c1_131 = arith.constant 1 : index
    %c0_132 = arith.constant 0 : index
    %c0_133 = arith.constant 0 : index
    %287 = vector.load %arg9[%c1_131, %c0_132, %c0_133] : memref<2x64x32xf32, #tpu.memory_space<vmem>>, vector<1x64x32xf32>
    %288 = vector.shape_cast %287 : vector<1x64x32xf32> to vector<64x32xf32>
    %cst_134 = arith.constant dense<0.000000e+00> : vector<16x32xf32>
    %289 = tpu.matmul %286, %288, %cst_134 {dimension_numbers = #tpu.dot_dimension_numbers<[1], [0], [0], [1], [0, 0, 1, 1], [], []>} : vector<16x64xf32>, vector<64x32xf32>, vector<16x32xf32> -> vector<16x32xf32>
    %c1_135 = arith.constant 1 : index
    %c0_136 = arith.constant 0 : index
    %c0_137 = arith.constant 0 : index
    %290 = vector.load %arg10[%c1_135, %c0_136, %c0_137] : memref<2x1x32xf32, #tpu.memory_space<vmem>>, vector<1x1x32xf32>
    %291 = vector.shape_cast %290 : vector<1x1x32xf32> to vector<1x32xf32>
    %292 = vector.broadcast %291 : vector<1x32xf32> to vector<16x32xf32>
    %293 = arith.addf %289, %292 : vector<16x32xf32>
    %294 = arith.addf %242, %293 : vector<16x32xf32>
    %c0_138 = arith.constant 0 : index
    %c0_139 = arith.constant 0 : index
    %295 = vector.load %arg11[%c0_138, %c0_139] : memref<16x32xf32, #tpu.memory_space<vmem>>, vector<16x32xf32>
    tpu.vector_store %arg11[%c0_138, %c0_139], %294 {strides = array<i32>} : memref<16x32xf32, #tpu.memory_space<vmem>>, vector<16x32xf32>,
    return
  }
  func.func @transform_0(%arg0: i32) -> (i32, i32) {
    %c0_i32 = arith.constant 0 : i32
    %c0_i32_0 = arith.constant 0 : i32
    return %arg0, %c0_i32 : i32, i32
  }
  func.func @transform_1(%arg0: i32) -> (i32, i32, i32) {
    %c0_i32 = arith.constant 0 : i32
    %c0_i32_0 = arith.constant 0 : i32
    %c0_i32_1 = arith.constant 0 : i32
    %c0_i32_2 = arith.constant 0 : i32
    return %c0_i32, %c0_i32_0, %c0_i32_1 : i32, i32, i32
  }
  func.func @transform_2(%arg0: i32) -> (i32, i32, i32, i32) {
    %c0_i32 = arith.constant 0 : i32
    %c0_i32_0 = arith.constant 0 : i32
    %c0_i32_1 = arith.constant 0 : i32
    %c0_i32_2 = arith.constant 0 : i32
    %c0_i32_3 = arith.constant 0 : i32
    return %c0_i32, %c0_i32_0, %c0_i32_1, %c0_i32_2 : i32, i32, i32, i32
  }
  func.func @transform_3(%arg0: i32) -> (i32, i32, i32, i32) {
    %c0_i32 = arith.constant 0 : i32
    %c0_i32_0 = arith.constant 0 : i32
    %c0_i32_1 = arith.constant 0 : i32
    %c0_i32_2 = arith.constant 0 : i32
    %c0_i32_3 = arith.constant 0 : i32
    return %c0_i32, %c0_i32_0, %c0_i32_1, %c0_i32_2 : i32, i32, i32, i32
  }
  func.func @transform_4(%arg0: i32) -> (i32, i32, i32) {
    %c0_i32 = arith.constant 0 : i32
    %c0_i32_0 = arith.constant 0 : i32
    %c0_i32_1 = arith.constant 0 : i32
    %c0_i32_2 = arith.constant 0 : i32
    return %c0_i32, %c0_i32_0, %c0_i32_1 : i32, i32, i32
  }
  func.func @transform_5(%arg0: i32) -> (i32, i32, i32) {
    %c0_i32 = arith.constant 0 : i32
    %c0_i32_0 = arith.constant 0 : i32
    %c0_i32_1 = arith.constant 0 : i32
    %c0_i32_2 = arith.constant 0 : i32
    return %c0_i32, %c0_i32_0, %c0_i32_1 : i32, i32, i32
  }
  func.func @transform_6(%arg0: i32) -> (i32, i32, i32) {
    %c0_i32 = arith.constant 0 : i32
    %c0_i32_0 = arith.constant 0 : i32
    %c0_i32_1 = arith.constant 0 : i32
    %c0_i32_2 = arith.constant 0 : i32
    return %c0_i32, %c0_i32_0, %c0_i32_1 : i32, i32, i32
  }
  func.func @transform_7(%arg0: i32) -> (i32, i32, i32) {
    %c0_i32 = arith.constant 0 : i32
    %c0_i32_0 = arith.constant 0 : i32
    %c0_i32_1 = arith.constant 0 : i32
    %c0_i32_2 = arith.constant 0 : i32
    return %c0_i32, %c0_i32_0, %c0_i32_1 : i32, i32, i32
  }
  func.func @transform_8(%arg0: i32) -> (i32, i32, i32) {
    %c0_i32 = arith.constant 0 : i32
    %c0_i32_0 = arith.constant 0 : i32
    %c0_i32_1 = arith.constant 0 : i32
    %c0_i32_2 = arith.constant 0 : i32
    return %c0_i32, %c0_i32_0, %c0_i32_1 : i32, i32, i32
  }
  func.func @transform_9(%arg0: i32) -> (i32, i32, i32) {
    %c0_i32 = arith.constant 0 : i32
    %c0_i32_0 = arith.constant 0 : i32
    %c0_i32_1 = arith.constant 0 : i32
    %c0_i32_2 = arith.constant 0 : i32
    return %c0_i32, %c0_i32_0, %c0_i32_1 : i32, i32, i32
  }
  func.func @transform_10(%arg0: i32) -> (i32, i32) {
    %c0_i32 = arith.constant 0 : i32
    %c0_i32_0 = arith.constant 0 : i32
    return %arg0, %c0_i32 : i32, i32
  }
}

</mosaic_0001>

<bundles_post_ra>
// kernel: tpu_custom_call.1
= control target key start
LH: loop header
LB: loop body
LE: loop exit
PB: predicated region body
PF: predicated region fallthrough
CT: control target
= control target key end

     0   :  { %15 = vsyncpa [#allocation3], 0  ;;  %s5725_s0 = inlined_call_operand.hbm [shape: f32[16,32], index: 0, kind: input, shape index: {}]   ;;  %s5726_s1 = inlined_call_operand.hbm [shape: f32[2,4,32], index: 1, kind: input, shape index: {}]   ;;  %s5727_s2 = inlined_call_operand.vmem [shape: f32[2,3,32,32], index: 2, kind: input, shape index: {}]   ;;  %s5728_s3 = inlined_call_operand.vmem [shape: f32[2,3,1,32], index: 3, kind: input, shape index: {}]   ;;  %s5729_s4 = inlined_call_operand.hbm [shape: f32[2,32,32], index: 4, kind: input, shape index: {}]   ;;  %s5730_s5 = inlined_call_operand.vmem [shape: f32[2,1,32], index: 5, kind: input, shape index: {}]   ;;  %s5731_s6 = inlined_call_operand.hbm [shape: f32[2,32,64], index: 6, kind: input, shape index: {}]   ;;  %s5732_s7 = inlined_call_operand.vmem [shape: f32[2,1,64], index: 7, kind: input, shape index: {}]   ;;  %s5733_s8 = inlined_call_operand.vmem [shape: f32[2,64,32], index: 8, kind: input, shape index: {}]   ;;  %s5734_s9 = inlined_call_operand.vmem [shape: f32[2,1,32], index: 9, kind: input, shape index: {}]   ;;  %s5735_s10 = inlined_call_operand.hbm [shape: f32[16,32], index: 10, kind: output, shape index: {}]  }
   0x1   :  { %16 = vsyncpa [#allocation6], 0 }
   0x2   :  { %17 = vsyncpa [#allocation9], 0 }
   0x3   :  { %18 = vsyncpa [#allocation4], 0  ;;  %s5029_s13 = smov [#allocation5]   ;;  %s4911_s17 = scalar_lea.hbm %s5726_s1, 128 }
   0x4   :  { %s36_s14 = sshll.u32 %s5029_s13, 4  ;;  %p4912_p0 = scmp.ne.s32.totalorder %s5726_s1, %s4911_s17  ;;  %s37_s14 = int_to_ptr.vmem [resolvable:$true] %s36_s14 }
   0x5   :  { %p4915_p1 = scmp.lt.u32.totalorder %s4911_s17, %s5726_s1 }
   0x7   :  { %p4917_p2 = pnand %p4915_p1, %p4912_p0 }
   0x9   :  { %4920 = shalt.err (!%p4917_p2)
}
   0xa   :  { %s4921_s22 = scalar_lea.vmem %s37_s14, 128  ;;  %p4926_p4 = scmp.lt.s32.totalorder %s37_s14, %s37_s14 }
   0xb   :  { %p4922_p3 = scmp.ne.s32.totalorder %s37_s14, %s4921_s22  ;;  %p4927_p5 = scmp.lt.s32.totalorder %s4921_s22, %s4921_s22 }
   0xd   :  { %p4928_p6 = por %p4927_p5, %p4926_p4 }
   0xf   :  { %p4929_p7 = pnand %p4928_p6, %p4922_p3 }
  0x11   :  { %4932 = shalt.err (!%p4929_p7)
}
  0x12   :  { %s5030_s23 = smov 64   ;;  %s5031_s24 = smov 4  }
  0x13   :  { %42 = dma.hbm_to_vmem [thread:$0]  %s5726_s1, 128, %s37_s14, [#allocation6], %s5030_s23, %s5030_s23, %s5031_s24  }
  0x14   :  { %s5032_s27 = smov [#allocation2]   ;;  %s4933_s11 = scalar_lea.hbm %s5725_s0, 256 }
  0x15   :  { %s24_s28 = sshll.u32 %s5032_s27, 4  ;;  %p4934_p8 = scmp.ne.s32.totalorder %s5725_s0, %s4933_s11  ;;  %s25_s28 = int_to_ptr.vmem [resolvable:$true] %s24_s28 }
  0x16   :  { %p4937_p9 = scmp.lt.u32.totalorder %s4933_s11, %s5725_s0 }
  0x18   :  { %p4939_p10 = pnand %p4937_p9, %p4934_p8 }
  0x1a   :  { %4942 = shalt.err (!%p4939_p10)
}
  0x1b   :  { %s4943_s17 = scalar_lea.vmem %s25_s28, 256  ;;  %p4948_p12 = scmp.lt.s32.totalorder %s25_s28, %s25_s28 }
  0x1c   :  { %p4944_p11 = scmp.ne.s32.totalorder %s25_s28, %s4943_s17  ;;  %p4949_p13 = scmp.lt.s32.totalorder %s4943_s17, %s4943_s17 }
  0x1e   :  { %p4950_p0 = por %p4949_p13, %p4948_p12 }
  0x20   :  { %p4951_p1 = pnand %p4950_p0, %p4944_p11 }
  0x22   :  { %4954 = shalt.err (!%p4951_p1)
}
  0x23   :  { %s5033_s1 = smov 128   ;;  %s5034_s14 = smov 8  }
  0x24   :  { %30 = dma.hbm_to_vmem [thread:$0]  %s5725_s0, 256, %s25_s28, [#allocation3], %s5033_s1, %s5033_s1, %s5034_s14  }
  0x25   :  { %s5035_s20 = smov [#allocation7]   ;;  %s5036_s22 = smov [#allocation8]  }
  0x26   :  { %s52_s21 = sshll.u32 %s5035_s20, 4  ;;  %s66_s23 = sshll.u32 %s5036_s22, 4  ;;  %s53_s21 = int_to_ptr.vmem [resolvable:$true] %s52_s21  ;;  %s5127_s23 = int_to_ptr.vmem [resolvable:$true] %s66_s23 }
  0x27   :  { %s4955_s26 = scalar_lea.hbm %s5729_s4, 1024 }
  0x28   :  { %p4956_p2 = scmp.ne.s32.totalorder %s5729_s4, %s4955_s26  ;;  %p4959_p3 = scmp.lt.u32.totalorder %s4955_s26, %s5729_s4 }
  0x2a   :  { %p4961_p4 = pnand %p4959_p3, %p4956_p2 }
  0x2c   :  { %4964 = shalt.err (!%p4961_p4)
}
  0x2d   :  { %s4965_s0 = scalar_lea.vmem %s53_s21, 1024  ;;  %p4970_p6 = scmp.lt.s32.totalorder %s53_s21, %s53_s21 }
  0x2e   :  { %p4966_p5 = scmp.ne.s32.totalorder %s53_s21, %s4965_s0  ;;  %p4971_p7 = scmp.lt.s32.totalorder %s4965_s0, %s4965_s0 }
  0x30   :  { %p4972_p8 = por %p4971_p7, %p4970_p6 }
  0x32   :  { %p4973_p9 = pnand %p4972_p8, %p4966_p5 }
  0x34   :  { %4976 = shalt.err (!%p4973_p9)
}
  0x35   :  { %58 = dma.hbm_to_vmem [thread:$0]  %s5729_s4, 1024, %s53_s21, [#allocation6], %s5033_s1, %s5033_s1, %s5034_s14  }
  0x36   :  { %s4977_s16 = scalar_lea.hbm %s5731_s6, 1024 }
  0x37   :  { %p4978_p10 = scmp.ne.s32.totalorder %s5731_s6, %s4977_s16  ;;  %p4981_p11 = scmp.lt.u32.totalorder %s4977_s16, %s5731_s6 }
  0x39   :  { %p4983_p12 = pnand %p4981_p11, %p4978_p10 }
  0x3b   :  { %4986 = shalt.err (!%p4983_p12)
}
  0x3c   :  { %s4987_s22 = scalar_lea.vmem %s5127_s23, 1024  ;;  %p4992_p0 = scmp.lt.s32.totalorder %s5127_s23, %s5127_s23 }
  0x3d   :  { %p4988_p13 = scmp.ne.s32.totalorder %s5127_s23, %s4987_s22  ;;  %p4993_p1 = scmp.lt.s32.totalorder %s4987_s22, %s4987_s22 }
  0x3f   :  { %p4994_p2 = por %p4993_p1, %p4992_p0 }
  0x41   :  { %p4995_p3 = pnand %p4994_p2, %p4988_p13 }
  0x43   :  { %4998 = shalt.err (!%p4995_p3)
}
  0x44   :  { %72 = dma.hbm_to_vmem [thread:$0]  %s5731_s6, 1024, %s5127_s23, [#allocation9], %s5033_s1, %s5033_s1, %s5034_s14  }
  0x45   :  { %5021 = dma.done.wait [#allocation3], 256  }
  0x46   :  { %5022 = vsyncadd [#allocation3], 4294967040 }
  0x47   :  { %5023 = dma.done.wait [#allocation6], 1152  }
  0x48   :  { %5024 = vsyncadd [#allocation6], 4294966144 }
  0x49   :  { %5025 = dma.done.wait [#allocation9], 1024  }
  0x4a   :  { %5026 = vsyncadd [#allocation9], 4294966272  ;;  %vm94_vm0 = vcmask 261120   ;;  %v5164_v0 = vld [vmem:[#allocation2] sm:$0xff]  ;;  %v5166_v1 = vld [vmem:[#allocation2 + $0x8] sm:$0xff]  ;;  %v122_v31 = vlaneseq  ;;  %v5037_v53 = vmov 0.0  }
  0x4b   :  { %v95_v2 = vsel %vm94_vm0, %v5164_v0, 0.0  ;;  %v98_v3 = vsel %vm94_vm0, %v5166_v1, 0.0  ;;  %v134_v14 = vld [vmem:[%s5727_s2] sm:$0xff]  ;;  %v135_v15 = vld [vmem:[%s5727_s2 + $0x8] sm:$0xff]  ;;  %v136_v19 = vld [vmem:[%s5727_s2 + $0x10] sm:$0xff]  ;;  %vm5038_vm1 = vmmov 0  }
  0x4c   :  { %96 = vadd.xlane.f32.xlu0 %v95_v2  ;;  %v4134_v16 = vld [vmem:[%s5727_s2 + $0x40] sm:$0xff]  ;;  %v4695_v17 = vpack.c.bf16 %v135_v15, %v134_v14  ;;  %v4135_v18 = vld [vmem:[%s5727_s2 + $0x48] sm:$0xff]  ;;  %v137_v20 = vld [vmem:[%s5727_s2 + $0x18] sm:$0xff]  ;;  %v5206_v35 = vshrl.u32 %v122_v31, 7  ;;  %s5039_s26 = smov 120   ;;  %s5040_s27 = smov 112  }
  0x4d   :  { %v4711_v21 = vpack.c.bf16 %v4135_v18, %v4134_v16  ;;  %v4699_v22 = vpack.c.bf16 %v137_v20, %v136_v19  ;;  %v4136_v23 = vld [vmem:[%s5727_s2 + $0x50] sm:$0xff]  ;;  %v4137_v24 = vld [vmem:[%s5727_s2 + $0x58] sm:$0xff]  ;;  %v4126_v26 = vld [vmem:[%s5727_s2 + $0x20] sm:$0xff]  ;;  %vm450_vm2 = vcmask 64512   ;;  %s5041_s11 = smov 104   ;;  %s5042_s12 = smov 16  }
  0x4e   :  { %4696 = vmatprep.subr.bf16.mxu1 %v4695_v17  ;;  %v4715_v25 = vpack.c.bf16 %v4137_v24, %v4136_v23  ;;  %v4127_v27 = vld [vmem:[%s5727_s2 + $0x28] sm:$0xff]  ;;  %v124_v37 = vsub.s32 0, %v5206_v35  ;;  %v5209_v38 = vld [vmem:[#allocation5] sm:$0xf]  ;;  %v130_v39 = vsub.s32 1, %v5206_v35  ;;  %v4129_v49 = vld [vmem:[%s5727_s2 + $0x38] sm:$0xff] }
  0x4f   :  { %4698 = vmatpush3.bf16.msra.mxu1 %v4695_v17  ;;  %4712 = vmatprep.subr.bf16.mxu0 %v4711_v21  ;;  %v4703_v28 = vpack.c.bf16 %v4127_v27, %v4126_v26  ;;  %v4128_v48 = vld [vmem:[%s5727_s2 + $0x30] sm:$0xff]  ;;  %v4123_v54 = vld [vmem:[%s5728_s3] ss:$0 sm:$0xff]  ;;  %v4131_v61 = vld [vmem:[%s5728_s3 + $0x1] ss:$0 sm:$0xff]  ;;  %s5043_s13 = smov 24  }
  0x50   :  { %99 = vadd.xlane.f32.xlu0 %v98_v3  ;;  %4714 = vmatpush3.bf16.msra.mxu0 %v4711_v21  ;;  %v125_v40 = vrot.slane %v5209_v38, %v124_v37  ;;  %v131_v43 = vrot.slane %v5209_v38, %v130_v39  ;;  %v4707_v52 = vpack.c.bf16 %v4129_v49, %v4128_v48  ;;  %vm1749_vm3 = vcmask 130048   ;;  %s5044_s25 = smov [#allocation10]  }
  0x51   :  { %4700 = vmatprep.subr.bf16.mxu1 %v4699_v22  ;;  %4716 = vmatprep.subr.bf16.mxu0 %v4715_v25  ;;  %vm1752_vm4 = vcmask 195584   ;;  %vm2012_vm5 = vcmask 523264   ;;  %s4109_s29 = sshll.u32 %s5044_s25, 4  ;;  %s4110_s29 = int_to_ptr.vmem [resolvable:$true] %s4109_s29 }
  0x52   :  { %s4999_s30 = scalar_lea.vmem %s4110_s29, 256  ;;  %p5004_p5 = scmp.lt.s32.totalorder %s4110_s29, %s4110_s29 }
  0x53   :  { %4702 = vmatpush3.bf16.msra.mxu1 %v4699_v22  ;;  %p5000_p4 = scmp.ne.s32.totalorder %s4110_s29, %s4999_s30  ;;  %p5005_p6 = scmp.lt.s32.totalorder %s4999_s30, %s4999_s30 }
  0x54   :  { %4718 = vmatpush3.bf16.msra.mxu0 %v4715_v25  ;;  %4704 = vmatprep.subr.bf16.mxu1 %v4703_v28 }
  0x55   :  { %4430 = vmatprep.subr.mxu0 %v5037_v53  ;;  %p5006_p7 = por %p5005_p6, %p5004_p5 }
  0x57   :  { %p5007_p8 = pnand %p5006_p7, %p5000_p4 }
  0xd9   :  { %v97_v4 = vpop.xlane.xlu0 %96 }
  0xda   :  { %v102_v5 = vmul.f32 0.03125, %v97_v4 }
  0xdc   :  { %v104_v6 = vsub.f32 %v5164_v0, %v102_v5 }
  0xdd   :  { %v100_v7 = vpop.xlane.xlu0 %99 }
  0xde   :  { %v103_v8 = vmul.f32 0.03125, %v100_v7  ;;  %v106_v9 = vmul.f32 %v104_v6, %v104_v6 }
  0xe0   :  { %v105_v10 = vsub.f32 %v5166_v1, %v103_v8  ;;  %v108_v11 = vsel %vm94_vm0, %v106_v9, 0.0 }
  0xe1   :  { %109 = vadd.xlane.f32.xlu1 %v108_v11 }
  0xe2   :  { %v107_v12 = vmul.f32 %v105_v10, %v105_v10 }
  0xe4   :  { %v111_v13 = vsel %vm94_vm0, %v107_v12, 0.0 }
  0xe5   :  { %112 = vadd.xlane.f32.xlu1 %v111_v13  ;;  %v4139_v13 = vld [vmem:[%s5728_s3 + $0x2] ss:$0 sm:$0xff] }
 0x16e   :  { %v110_v29 = vpop.xlane.xlu1 %109 }
 0x16f   :  { %v114_v30 = vmul.f32 0.03125, %v110_v29 }
 0x171   :  { %v116_v32 = vadd.f32 1e-06, %v114_v30 }
 0x172   :  { %v113_v33 = vpop.xlane.xlu1 %112 }
 0x173   :  { %4823 = vrsqrt.f32 %v116_v32  ;;  %v115_v34 = vmul.f32 0.03125, %v113_v33 }
 0x175   :  { %v117_v36 = vadd.f32 1e-06, %v115_v34 }
 0x177   :  { %4825 = vrsqrt.f32 %v117_v36 }
 0x17d   :  { %v4824_v41 = vpop.eup %4823 }
 0x17e   :  { %v120_v42 = vmul.f32 %v4824_v41, %v104_v6 }
 0x180   :  { %v126_v44 = vmul.f32 %v125_v40, %v120_v42 }
 0x181   :  { %v4826_v45 = vpop.eup %4825 }
 0x182   :  { %v132_v46 = vadd.f32 %v131_v43, %v126_v44  ;;  %v121_v47 = vmul.f32 %v4826_v45, %v105_v10 }
 0x184   :  { %4395 = vmatprep.mubr.msk.f32.mxu1 %vm94_vm0, %v132_v46  ;;  %4417 = vmatprep.mubr.msk.f32.mxu0 %vm94_vm0, %v132_v46  ;;  %v127_v50 = vmul.f32 %v125_v40, %v121_v47 }
 0x186   :  { %v133_v51 = vadd.f32 %v131_v43, %v127_v50 }
 0x188   :  { %4396 = vmatmul.mubr.msk.f32.vlgmr.msra.gmra.mrb[0].mxu1 %vm94_vm0, %v133_v51  ;;  %4418 = vmatmul.mubr.msk.f32.vlgmr.msra.gmra.mrb[0].mxu0 %vm94_vm0, %v133_v51 }
 0x189   :  { %4706 = vmatpush3.bf16.msra.mxu1 %v4703_v28  ;;  %4406 = vmatprep.mubr.msk.f32.mxu1 %vm94_vm0, %v132_v46 }
 0x18a   :  { %4708 = vmatprep.subr.bf16.mxu1 %v4707_v52  ;;  %4432 = vmatprep.mubr.msk.f32.mxu0 %vm5038_vm1, %v5037_v53 }
 0x18d   :  { %4710 = vmatpush3.bf16.msra.mxu1 %v4707_v52 }
 0x18e   :  { %4420 = vmatprep.subr.mxu1 %v5037_v53 }
 0x190   :  { %4407 = vmatmul.mubr.msk.f32.vlgmr.msra.gmra.mrb[2].mxu1 %vm94_vm0, %v133_v51 }
 0x191   :  { %4422 = vmatprep.mubr.msk.f32.mxu1 %vm5038_vm1, %v5037_v53 }
 0x25b   :  { %v4397_v55 = vpop.f32.mrb[0].mxu1  ;;  %v5239_v56 = vpop.f32.mrb[0].mxu0 }
 0x25c   :  { %v223_v57 = vadd.f32 %v4397_v55, %v4123_v54  ;;  %v217_v58 = vpop.f32.mrb[1].mxu1  ;;  %v393_v59 = vpop.f32.mrb[1].mxu0  ;;  %v5300_v17 = vadd.f32 %v5239_v56, %v4139_v13 }
 0x25d   :  { %v218_v60 = vadd.f32 %v4123_v54, %v217_v58  ;;  %v5289_v15 = vadd.f32 %v4139_v13, %v393_v59 }
 0x25e   :  { %410 = vrot.lane.b32.xlu1 %v223_v57, %s5039_s26 }
 0x25f   :  { %422 = vrot.lane.b32.xlu0 %v218_v60, %s5040_s27 }
 0x262   :  { %424 = vrot.lane.b32.xlu1 %v223_v57, %s5040_s27 }
 0x263   :  { %v4408_v62 = vpop.f32.mrb[2].mxu1 }
 0x264   :  { %v305_v63 = vpop.f32.mrb[3].mxu1  ;;  %v311_v3 = vadd.f32 %v4408_v62, %v4131_v61 }
 0x265   :  { %v306_v2 = vadd.f32 %v4131_v61, %v305_v63 }
 0x266   :  { %408 = vrot.lane.b32.xlu1 %v218_v60, %s5039_s26 }
 0x267   :  { %4421 = vmatpush3.xpose.msk.msra.mxu1 %vm450_vm2, %v306_v2  ;;  %412 = vrot.lane.b32.xlu0 %v306_v2, %s5039_s26 }
 0x268   :  { %4425 = vmatprep.subr.mxu1 %v5037_v53 }
 0x26a   :  { %4423 = vmatmul.mubr.msk.f32.vlgmr.msra.gmra.mrb[4].mxu1 %vm450_vm2, %v218_v60  ;;  %414 = vrot.lane.b32.xlu1 %v311_v3, %s5039_s26 }
 0x26b   :  { %426 = vrot.lane.b32.xlu0 %v306_v2, %s5040_s27  ;;  %4426 = vmatpush3.xpose.msk.msra.mxu1 %vm450_vm2, %v311_v3 }
 0x26c   :  { %4427 = vmatprep.mubr.msk.f32.mxu1 %vm5038_vm1, %v5037_v53  ;;  %4435 = vmatprep.subr.mxu1 %v5037_v53 }
 0x26e   :  { %4428 = vmatmul.mubr.msk.f32.vlgmr.msra.gmra.mrb[6].mxu1 %vm450_vm2, %v223_v57  ;;  %428 = vrot.lane.b32.xlu1 %v311_v3, %s5040_s27 }
 0x26f   :  { %440 = vrot.lane.b32.xlu0 %v306_v2, %s5041_s11  ;;  %4437 = vmatprep.mubr.msk.f32.mxu1 %vm5038_vm1, %v5037_v53 }
 0x272   :  { %442 = vrot.lane.b32.xlu1 %v311_v3, %s5041_s11 }
 0x273   :  { %436 = vrot.lane.b32.xlu0 %v218_v60, %s5041_s11 }
 0x276   :  { %438 = vrot.lane.b32.xlu1 %v223_v57, %s5041_s11 }
 0x2d0   :  { %v411_v4 = vpop.permute.xlu1 %410 }
 0x2d1   :  { %v423_v6 = vpop.permute.xlu0 %422 }
 0x2d4   :  { %v425_v5 = vpop.permute.xlu1 %424 }
 0x2d8   :  { %v409_v7 = vpop.permute.xlu1 %408 }
 0x2d9   :  { %v413_v8 = vpop.permute.xlu0 %412 }
 0x2da   :  { %4431 = vmatpush3.xpose.msk.msra.mxu0 %vm450_vm2, %v413_v8 }
 0x2db   :  { %4440 = vmatprep.subr.mxu0 %v5037_v53 }
 0x2dc   :  { %v415_v9 = vpop.permute.xlu1 %414 }
 0x2dd   :  { %v427_v10 = vpop.permute.xlu0 %426  ;;  %4433 = vmatmul.mubr.msk.f32.vlgmr.msra.gmra.mrb[2].mxu0 %vm450_vm2, %v409_v7  ;;  %4436 = vmatpush3.xpose.msk.msra.mxu1 %vm450_vm2, %v415_v9 }
 0x2de   :  { %4441 = vmatpush3.xpose.msk.msra.mxu0 %vm450_vm2, %v427_v10  ;;  %4442 = vmatprep.mubr.msk.f32.mxu0 %vm5038_vm1, %v5037_v53 }
 0x2df   :  { %4450 = vmatprep.subr.mxu0 %v5037_v53  ;;  %4445 = vmatprep.subr.mxu1 %v5037_v53 }
 0x2e0   :  { %v429_v11 = vpop.permute.xlu1 %428  ;;  %4438 = vmatmul.mubr.msk.f32.vlgmr.msra.gmra.mrb[8].mxu1 %vm450_vm2, %v411_v4 }
 0x2e1   :  { %v441_v12 = vpop.permute.xlu0 %440  ;;  %4443 = vmatmul.mubr.msk.f32.vlgmr.msra.gmra.mrb[4].mxu0 %vm450_vm2, %v423_v6  ;;  %4446 = vmatpush3.xpose.msk.msra.mxu1 %vm450_vm2, %v429_v11 }
 0x2e2   :  { %4451 = vmatpush3.xpose.msk.msra.mxu0 %vm450_vm2, %v441_v12  ;;  %4447 = vmatprep.mubr.msk.f32.mxu1 %vm5038_vm1, %v5037_v53 }
 0x2e3   :  { %4452 = vmatprep.mubr.msk.f32.mxu0 %vm5038_vm1, %v5037_v53  ;;  %4460 = vmatprep.subr.mxu0 %v5037_v53 }
 0x2e4   :  { %v443_v14 = vpop.permute.xlu1 %442  ;;  %4448 = vmatmul.mubr.msk.f32.vlgmr.msra.gmra.mrb[10].mxu1 %vm450_vm2, %v425_v5  ;;  %4455 = vmatprep.subr.mxu1 %v5037_v53 }
 0x2e5   :  { %v437_v16 = vpop.permute.xlu0 %436  ;;  %4456 = vmatpush3.xpose.msk.msra.mxu1 %vm450_vm2, %v443_v14  ;;  %4457 = vmatprep.mubr.msk.f32.mxu1 %vm5038_vm1, %v5037_v53 }
 0x2e6   :  { %4453 = vmatmul.mubr.msk.f32.vlgmr.msra.gmra.mrb[6].mxu0 %vm450_vm2, %v437_v16  ;;  %4465 = vmatprep.subr.mxu1 %v5037_v53 }
 0x2e7   :  { %4461 = vmatpush3.msra.mxu0 %v5289_v15  ;;  %4462 = vmatprep.mubr.msk.f32.mxu0 %vm5038_vm1, %v5037_v53 }
 0x2e8   :  { %v439_v18 = vpop.permute.xlu1 %438  ;;  %4470 = vmatprep.subr.mxu0 %v5037_v53 }
 0x2e9   :  { %4458 = vmatmul.mubr.msk.f32.vlgmr.msra.gmra.mrb[12].mxu1 %vm450_vm2, %v439_v18 }
 0x2ea   :  { %4466 = vmatpush3.msra.mxu1 %v5300_v17  ;;  %4467 = vmatprep.mubr.msk.f32.mxu1 %vm5038_vm1, %v5037_v53 }
 0x2eb   :  { %4475 = vmatprep.subr.mxu1 %v5037_v53 }
 0x33d   :  { %v521_v19 = vpop.f32.mrb[4].mxu1 }
 0x33e   :  { %v1043_v20 = vmul.f32 0.35355338, %v521_v19  ;;  %v4424_v21 = vpop.f32.mrb[5].mxu1 }
 0x340   :  { %v1051_v22 = vsel %vm450_vm2, %v1043_v20, -inf }
 0x341   :  { %1052 = vmax.xlane.f32.xlu0 %v1051_v22  ;;  %v595_v23 = vpop.f32.mrb[6].mxu1 }
 0x342   :  { %v1044_v24 = vmul.f32 0.35355338, %v595_v23  ;;  %v4429_v25 = vpop.f32.mrb[7].mxu1 }
 0x344   :  { %v1054_v26 = vsel %vm450_vm2, %v1044_v24, -inf }
 0x345   :  { %1055 = vmax.xlane.f32.xlu1 %v1054_v26 }
 0x3b0   :  { %v669_v27 = vpop.f32.mrb[2].mxu0 }
 0x3b1   :  { %v4434_v28 = vpop.f32.mrb[3].mxu0  ;;  %v1045_v34 = vmul.f32 0.35355338, %v669_v27 }
 0x3b3   :  { %v743_v29 = vpop.f32.mrb[8].mxu1  ;;  %v1057_v46 = vsel %vm450_vm2, %v1045_v34, -inf }
 0x3b4   :  { %v1046_v30 = vmul.f32 0.35355338, %v743_v29  ;;  %v817_v31 = vpop.f32.mrb[4].mxu0  ;;  %v4439_v32 = vpop.f32.mrb[9].mxu1 }
 0x3b5   :  { %v4444_v33 = vpop.f32.mrb[5].mxu0  ;;  %v1047_v44 = vmul.f32 0.35355338, %v817_v31 }
 0x3b6   :  { %v1060_v36 = vsel %vm450_vm2, %v1046_v30, -inf }
 0x3b7   :  { %1061 = vmax.xlane.f32.xlu0 %v1060_v36  ;;  %v891_v40 = vpop.f32.mrb[10].mxu1  ;;  %v1063_v52 = vsel %vm450_vm2, %v1047_v44, -inf }
 0x3b8   :  { %v1048_v41 = vmul.f32 0.35355338, %v891_v40  ;;  %v4449_v42 = vpop.f32.mrb[11].mxu1 }
 0x3b9   :  { %v965_v43 = vpop.f32.mrb[6].mxu0 }
 0x3ba   :  { %v4454_v45 = vpop.f32.mrb[7].mxu0  ;;  %v1066_v47 = vsel %vm450_vm2, %v1048_v41, -inf  ;;  %v1049_v51 = vmul.f32 0.35355338, %v965_v43 }
 0x3bb   :  { %1058 = vmax.xlane.f32.xlu0 %v1057_v46  ;;  %1067 = vmax.xlane.f32.xlu1 %v1066_v47 }
 0x3bc   :  { %v1039_v48 = vpop.f32.mrb[12].mxu1  ;;  %v1069_v55 = vsel %vm450_vm2, %v1049_v51, -inf }
 0x3bd   :  { %v1050_v49 = vmul.f32 0.35355338, %v1039_v48  ;;  %v4459_v50 = vpop.f32.mrb[13].mxu1 }
 0x3bf   :  { %1064 = vmax.xlane.f32.xlu0 %v1063_v52  ;;  %v1072_v54 = vsel %vm450_vm2, %v1050_v49, -inf }
 0x3c0   :  { %1073 = vmax.xlane.f32.xlu1 %v1072_v54 }
 0x3c3   :  { %1070 = vmax.xlane.f32.xlu0 %v1069_v55 }
 0x3ce   :  { %v1053_v56 = vpop.xlane.xlu0 %1052 }
 0x3cf   :  { %v1075_v57 = vsub.f32 %v1043_v20, %v1053_v56 }
 0x3d1   :  { %418 = vrot.lane.b32.xlu1 %v5300_v17, %s5039_s26  ;;  %v1083_v59 = vmul.f32 1.442695, %v1075_v57 }
 0x3d2   :  { %v1056_v58 = vpop.xlane.xlu1 %1055 }
 0x3d3   :  { %v1076_v60 = vsub.f32 %v1044_v24, %v1056_v58  ;;  %4827 = vpow2.f32 %v1083_v59 }
 0x3d5   :  { %430 = vrot.lane.b32.xlu1 %v5289_v15, %s5040_s27  ;;  %v1085_v61 = vmul.f32 1.442695, %v1076_v60 }
 0x3d7   :  { %4829 = vpow2.f32 %v1085_v61 }
 0x3d9   :  { %416 = vrot.lane.b32.xlu0 %v5289_v15, %s5039_s26  ;;  %432 = vrot.lane.b32.xlu1 %v5300_v17, %s5040_s27 }
 0x3dd   :  { %v4828_v62 = vpop.eup %4827 }
 0x3de   :  { %v1099_v63 = vsel %vm450_vm2, %v4828_v62, 0.0 }
 0x3e1   :  { %v4830_v2 = vpop.eup %4829 }
 0x3e2   :  { %v1102_v3 = vsel %vm450_vm2, %v4830_v2, 0.0 }
 0x3f8   :  { %1100 = vadd.xlane.f32.xlu0 %v1099_v63 }
 0x3fd   :  { %1103 = vadd.xlane.f32.xlu1 %v1102_v3 }
 0x444   :  { %v1062_v4 = vpop.xlane.xlu0 %1061 }
 0x445   :  { %v1078_v5 = vsub.f32 %v1046_v30, %v1062_v4 }
 0x447   :  { %v1089_v6 = vmul.f32 1.442695, %v1078_v5 }
 0x448   :  { %v1059_v7 = vpop.xlane.xlu0 %1058  ;;  %v1068_v8 = vpop.xlane.xlu1 %1067 }
 0x449   :  { %4831 = vpow2.f32 %v1089_v6  ;;  %v1077_v9 = vsub.f32 %v1045_v34, %v1059_v7  ;;  %v1080_v10 = vsub.f32 %v1048_v41, %v1068_v8 }
 0x44b   :  { %v1087_v11 = vmul.f32 1.442695, %v1077_v9  ;;  %v1093_v12 = vmul.f32 1.442695, %v1080_v10 }
 0x44c   :  { %v1065_v13 = vpop.xlane.xlu0 %1064 }
 0x44d   :  { %4833 = vpow2.f32 %v1087_v11  ;;  %v1079_v14 = vsub.f32 %v1047_v44, %v1065_v13  ;;  %v1074_v16 = vpop.xlane.xlu1 %1073  ;;  %v1755_v11 = vld [vmem:[#allocation7] sm:$0xff] }
 0x44e   :  { %4835 = vpow2.f32 %v1093_v12  ;;  %v1082_v18 = vsub.f32 %v1050_v49, %v1074_v16  ;;  %v1756_v12 = vld [vmem:[#allocation7 + $0x8] sm:$0xff]  ;;  %v1758_v16 = vld [vmem:[#allocation7 + $0x18] sm:$0xff] }
 0x44f   :  { %v1091_v19 = vmul.f32 1.442695, %v1079_v14  ;;  %v4719_v13 = vpack.c.bf16 %v1756_v12, %v1755_v11  ;;  %v1757_v14 = vld [vmem:[#allocation7 + $0x10] sm:$0xff] }
 0x450   :  { %v1097_v20 = vmul.f32 1.442695, %v1082_v18  ;;  %v1071_v21 = vpop.xlane.xlu0 %1070  ;;  %v4723_v18 = vpack.c.bf16 %v1758_v16, %v1757_v14  ;;  %v1883_v14 = vsub.s32 3, %v5206_v35 }
 0x451   :  { %4837 = vpow2.f32 %v1091_v19  ;;  %v1081_v22 = vsub.f32 %v1049_v51, %v1071_v21  ;;  %v419_v40 = vpop.permute.xlu1 %418 }
 0x452   :  { %4839 = vpow2.f32 %v1097_v20 }
 0x453   :  { %v4832_v23 = vpop.eup %4831  ;;  %v1095_v24 = vmul.f32 1.442695, %v1081_v22 }
 0x454   :  { %v1108_v25 = vsel %vm450_vm2, %v4832_v23, 0.0  ;;  %v417_v42 = vpop.permute.xlu0 %416 }
 0x455   :  { %4841 = vpow2.f32 %v1095_v24  ;;  %1109 = vadd.xlane.f32.xlu1 %v1108_v25  ;;  %v431_v41 = vpop.permute.xlu1 %430 }
 0x457   :  { %v4834_v26 = vpop.eup %4833 }
 0x458   :  { %v4836_v27 = vpop.eup %4835  ;;  %v1105_v28 = vsel %vm450_vm2, %v4834_v26, 0.0 }
 0x459   :  { %1106 = vadd.xlane.f32.xlu0 %v1105_v28  ;;  %v1114_v29 = vsel %vm450_vm2, %v4836_v27, 0.0  ;;  %v433_v44 = vpop.permute.xlu1 %432 }
 0x45a   :  { %1115 = vadd.xlane.f32.xlu1 %v1114_v29 }
 0x45b   :  { %v4838_v30 = vpop.eup %4837 }
 0x45c   :  { %v4840_v31 = vpop.eup %4839  ;;  %v1111_v32 = vsel %vm450_vm2, %v4838_v30, 0.0 }
 0x45d   :  { %1112 = vadd.xlane.f32.xlu0 %v1111_v32  ;;  %v1120_v33 = vsel %vm450_vm2, %v4840_v31, 0.0 }
 0x45e   :  { %1121 = vadd.xlane.f32.xlu1 %v1120_v33 }
 0x45f   :  { %v5331_v34 = vpop.eup %4841 }
 0x460   :  { %v1117_v36 = vsel %vm450_vm2, %v5331_v34, 0.0 }
 0x461   :  { %1118 = vadd.xlane.f32.xlu0 %v1117_v36 }
 0x46f   :  { %446 = vrot.lane.b32.xlu1 %v5300_v17, %s5041_s11 }
 0x477   :  { %444 = vrot.lane.b32.xlu0 %v5289_v15, %s5041_s11 }
 0x485   :  { %v1101_v43 = vpop.xlane.xlu0 %1100 }
 0x486   :  { %4843 = vrcp.f32 %v1101_v43 }
 0x48a   :  { %v1104_v45 = vpop.xlane.xlu1 %1103 }
 0x48b   :  { %4845 = vrcp.f32 %v1104_v45 }
 0x490   :  { %v4844_v46 = vpop.eup %4843 }
 0x491   :  { %v1131_v47 = vmul.f32 %v4844_v46, %v4828_v62 }
 0x493   :  { %4463 = vmatmul.mubr.msk.f32.vlgmr.msra.gmra.mrb[8].mxu0 %vm450_vm2, %v1131_v47  ;;  %v4166_v47 = vld [vmem:[%s5730_s5] ss:$0 sm:$0xff] }
 0x494   :  { %4471 = vmatpush3.msra.mxu0 %v417_v42  ;;  %4472 = vmatprep.mubr.msk.f32.mxu0 %vm5038_vm1, %v5037_v53 }
 0x495   :  { %v4846_v17 = vpop.eup %4845  ;;  %4480 = vmatprep.subr.mxu0 %v5037_v53 }
 0x496   :  { %v1132_v15 = vmul.f32 %v4846_v17, %v4830_v2 }
 0x498   :  { %4468 = vmatmul.mubr.msk.f32.vlgmr.msra.gmra.mrb[14].mxu1 %vm450_vm2, %v1132_v15 }
 0x499   :  { %4476 = vmatpush3.msra.mxu1 %v419_v40  ;;  %4477 = vmatprep.mubr.msk.f32.mxu1 %vm5038_vm1, %v5037_v53 }
 0x49a   :  { %4485 = vmatprep.subr.mxu1 %v5037_v53 }
 0x4e2   :  { %v1110_v48 = vpop.xlane.xlu1 %1109 }
 0x4e3   :  { %4847 = vrcp.f32 %v1110_v48 }
 0x4e6   :  { %v1107_v49 = vpop.xlane.xlu0 %1106 }
 0x4e7   :  { %4849 = vrcp.f32 %v1107_v49  ;;  %v1116_v50 = vpop.xlane.xlu1 %1115 }
 0x4e8   :  { %4851 = vrcp.f32 %v1116_v50 }
 0x4ea   :  { %v1113_v51 = vpop.xlane.xlu0 %1112 }
 0x4eb   :  { %4853 = vrcp.f32 %v1113_v51  ;;  %v1122_v52 = vpop.xlane.xlu1 %1121 }
 0x4ec   :  { %4855 = vrcp.f32 %v1122_v52 }
 0x4ed   :  { %v4848_v54 = vpop.eup %4847 }
 0x4ee   :  { %v1134_v55 = vmul.f32 %v4848_v54, %v4832_v23  ;;  %v1119_v56 = vpop.xlane.xlu0 %1118 }
 0x4ef   :  { %4857 = vrcp.f32 %v1119_v56  ;;  %v447_v62 = vpop.permute.xlu1 %446 }
 0x4f0   :  { %4478 = vmatmul.mubr.msk.f32.vlgmr.msra.gmra.mrb[16].mxu1 %vm450_vm2, %v1134_v55 }
 0x4f1   :  { %v4850_v57 = vpop.eup %4849  ;;  %4486 = vmatpush3.msra.mxu1 %v433_v44  ;;  %4487 = vmatprep.mubr.msk.f32.mxu1 %vm5038_vm1, %v5037_v53 }
 0x4f2   :  { %v4852_v58 = vpop.eup %4851  ;;  %v1133_v59 = vmul.f32 %v4850_v57, %v4834_v26  ;;  %4495 = vmatprep.subr.mxu1 %v5037_v53  ;;  %v445_v4 = vpop.permute.xlu0 %444 }
 0x4f3   :  { %v1136_v60 = vmul.f32 %v4852_v58, %v4836_v27 }
 0x4f4   :  { %4473 = vmatmul.mubr.msk.f32.vlgmr.msra.gmra.mrb[10].mxu0 %vm450_vm2, %v1133_v59 }
 0x4f5   :  { %v4854_v61 = vpop.eup %4853  ;;  %4481 = vmatpush3.msra.mxu0 %v431_v41  ;;  %4488 = vmatmul.mubr.msk.f32.vlgmr.msra.gmra.mrb[18].mxu1 %vm450_vm2, %v1136_v60 }
 0x4f6   :  { %v4856_v63 = vpop.eup %4855  ;;  %v1135_v2 = vmul.f32 %v4854_v61, %v4838_v30  ;;  %4496 = vmatpush3.msra.mxu1 %v447_v62  ;;  %4482 = vmatprep.mubr.msk.f32.mxu0 %vm5038_vm1, %v5037_v53 }
 0x4f7   :  { %v1138_v3 = vmul.f32 %v4856_v63, %v4840_v31  ;;  %4490 = vmatprep.subr.mxu0 %v5037_v53  ;;  %4497 = vmatprep.mubr.msk.f32.mxu1 %vm5038_vm1, %v5037_v53  ;;  %v1887_v63 = vld [vmem:[#allocation8] sm:$0xff] }
 0x4f8   :  { %4483 = vmatmul.mubr.msk.f32.vlgmr.msra.gmra.mrb[12].mxu0 %vm450_vm2, %v1135_v2  ;;  %v1888_v2 = vld [vmem:[#allocation8 + $0x8] sm:$0xff] }
 0x4f9   :  { %v4858_v5 = vpop.eup %4857  ;;  %4491 = vmatpush3.msra.mxu0 %v445_v4  ;;  %4498 = vmatmul.mubr.msk.f32.vlgmr.msra.gmra.mrb[20].mxu1 %vm450_vm2, %v1138_v3  ;;  %v4727_v3 = vpack.c.bf16 %v1888_v2, %v1887_v63  ;;  %v1889_v4 = vld [vmem:[#allocation8 + $0x10] sm:$0xff]  ;;  %v4172_v2 = vld [vmem:[%s5734_s9] ss:$0 sm:$0xff] }
 0x4fa   :  { %v1137_v6 = vmul.f32 %v4858_v5, %v5331_v34  ;;  %4492 = vmatprep.mubr.msk.f32.mxu0 %vm5038_vm1, %v5037_v53  ;;  %4720 = vmatprep.subr.bf16.mxu0 %v4719_v13  ;;  %v1890_v5 = vld [vmem:[#allocation8 + $0x18] sm:$0xff] }
 0x4fb   :  { %4728 = vmatprep.subr.bf16.mxu1 %v4727_v3 }
 0x4fc   :  { %4493 = vmatmul.mubr.msk.f32.vlgmr.msra.gmra.mrb[14].mxu0 %vm450_vm2, %v1137_v6  ;;  %4730 = vmatpush3.bf16.msra.mxu1 %v4727_v3  ;;  %v4731_v6 = vpack.c.bf16 %v1890_v5, %v1889_v4 }
 0x4fd   :  { %4722 = vmatpush3.bf16.msra.mxu0 %v4719_v13  ;;  %v1877_v13 = vsub.s32 2, %v5206_v35  ;;  %v4232_v35 = vld [vmem:[%s5733_s8 + $0x48] sm:$0xff] }
 0x4fe   :  { %4724 = vmatprep.subr.bf16.mxu0 %v4723_v18  ;;  %4732 = vmatprep.subr.bf16.mxu1 %v4731_v6 }
 0x4ff   :  { %v1878_v16 = vrot.slane %v5209_v38, %v1877_v13 }
 0x500   :  { %4734 = vmatpush3.bf16.msra.mxu1 %v4731_v6 }
 0x501   :  { %4726 = vmatpush3.bf16.msra.mxu0 %v4723_v18 }
 0x566   :  { %v1208_v7 = vpop.f32.mrb[8].mxu0 }
 0x567   :  { %v4464_v8 = vpop.f32.mrb[9].mxu0 }
 0x56b   :  { %v1281_v9 = vpop.f32.mrb[14].mxu1 }
 0x56c   :  { %v4469_v10 = vpop.f32.mrb[15].mxu1 }
 0x5c3   :  { %v1427_v19 = vpop.f32.mrb[16].mxu1 }
 0x5c4   :  { %1727 = vrot.lane.b32.xlu1 %v1427_v19, %s5034_s14  ;;  %v4479_v20 = vpop.f32.mrb[17].mxu1 }
 0x5c5   :  { %v1884_v20 = vrot.slane %v5209_v38, %v1883_v14  ;;  %v1999_v38 = vld [vmem:[%s5733_s8 + $0x10] sm:$0xff] }
 0x5c7   :  { %v1354_v21 = vpop.f32.mrb[10].mxu0 }
 0x5c8   :  { %v1573_v22 = vpop.f32.mrb[18].mxu1  ;;  %1725 = vrot.lane.b32.xlu0 %v1354_v21, %s5034_s14  ;;  %v4474_v23 = vpop.f32.mrb[11].mxu0 }
 0x5c9   :  { %1735 = vrot.lane.b32.xlu1 %v1573_v22, %s5042_s12  ;;  %v4489_v24 = vpop.f32.mrb[19].mxu1 }
 0x5cb   :  { %v1500_v25 = vpop.f32.mrb[12].mxu0 }
 0x5cc   :  { %1733 = vrot.lane.b32.xlu0 %v1500_v25, %s5042_s12  ;;  %v4484_v26 = vpop.f32.mrb[13].mxu0  ;;  %v1719_v27 = vpop.f32.mrb[20].mxu1 }
 0x5cd   :  { %1743 = vrot.lane.b32.xlu1 %v1719_v27, %s5043_s13  ;;  %v4499_v28 = vpop.f32.mrb[21].mxu1  ;;  %v1997_v27 = vld [vmem:[%s5733_s8] sm:$0xff] }
 0x5ce   :  { %v1998_v28 = vld [vmem:[%s5733_s8 + $0x8] sm:$0xff] }
 0x5cf   :  { %v1646_v29 = vpop.f32.mrb[14].mxu0 }
 0x5d0   :  { %1741 = vrot.lane.b32.xlu0 %v1646_v29, %s5043_s13  ;;  %v4494_v30 = vpop.f32.mrb[15].mxu0  ;;  %v4735_v29 = vpack.c.bf16 %v1998_v28, %v1997_v27  ;;  %v4192_v27 = vld [vmem:[%s5727_s2 + $0xa8] sm:$0xff] }
 0x5d1   :  { %v2000_v30 = vld [vmem:[%s5733_s8 + $0x18] sm:$0xff] }
 0x5d2   :  { %4736 = vmatprep.subr.bf16.mxu0 %v4735_v29 }
 0x636   :  { %v1728_v31 = vpop.permute.xlu1 %1727 }
 0x637   :  { %v1748_v41 = vsel %vm450_vm2, %v1281_v9, %v1728_v31  ;;  %v4739_v31 = vpack.c.bf16 %v2000_v30, %v1999_v38  ;;  %v4177_v38 = vld [vmem:[%s5727_s2 + $0x70] sm:$0xff] }
 0x638   :  { %v4193_v30 = vld [vmem:[%s5727_s2 + $0xb0] sm:$0xff] }
 0x63a   :  { %v1726_v32 = vpop.permute.xlu0 %1725 }
 0x63b   :  { %v1736_v33 = vpop.permute.xlu1 %1735  ;;  %v1747_v36 = vsel %vm450_vm2, %v1208_v7, %v1726_v32  ;;  %v2001_v32 = vld [vmem:[%s5733_s8 + $0x20] sm:$0xff] }
 0x63c   :  { %v1751_v44 = vsel %vm1749_vm3, %v1748_v41, %v1736_v33  ;;  %v2002_v33 = vld [vmem:[%s5733_s8 + $0x28] sm:$0xff] }
 0x63e   :  { %v1734_v34 = vpop.permute.xlu0 %1733 }
 0x63f   :  { %v1744_v40 = vpop.permute.xlu1 %1743  ;;  %v1750_v42 = vsel %vm1749_vm3, %v1747_v36, %v1734_v34  ;;  %v4743_v34 = vpack.c.bf16 %v2002_v33, %v2001_v32  ;;  %v2003_v36 = vld [vmem:[%s5733_s8 + $0x30] sm:$0xff]  ;;  %v4194_v32 = vld [vmem:[%s5727_s2 + $0xb8] sm:$0xff] }
 0x640   :  { %v1754_v46 = vsel %vm1752_vm4, %v1751_v44, %v1744_v40  ;;  %v2004_v40 = vld [vmem:[%s5733_s8 + $0x38] sm:$0xff]  ;;  %v4771_v33 = vpack.c.bf16 %v4194_v32, %v4193_v30 }
 0x641   :  { %v4747_v41 = vpack.c.bf16 %v2004_v40, %v2003_v36  ;;  %v4184_v36 = vld [vmem:[%s5727_s2 + $0x88] sm:$0xff] }
 0x642   :  { %v1742_v43 = vpop.permute.xlu0 %1741 }
 0x643   :  { %v1753_v45 = vsel %vm1752_vm4, %v1750_v42, %v1742_v43  ;;  %v4169_v42 = vld [vmem:[%s5732_s7] ss:$0 sm:$0xff] }
 0x644   :  { %4508 = vmatprep.mubr.msk.f32.mxu0 %vm94_vm0, %v1753_v45 }
 0x645   :  { %4509 = vmatmul.mubr.msk.f32.vlgmr.msra.gmra.mrb[16].mxu0 %vm94_vm0, %v1754_v46 }
 0x646   :  { %4738 = vmatpush3.bf16.msra.mxu0 %v4735_v29  ;;  %v4178_v29 = vld [vmem:[%s5727_s2 + $0x78] sm:$0xff] }
 0x647   :  { %4740 = vmatprep.subr.bf16.mxu0 %v4739_v31 }
 0x64a   :  { %4742 = vmatpush3.bf16.msra.mxu0 %v4739_v31  ;;  %v4755_v31 = vpack.c.bf16 %v4178_v29, %v4177_v38 }
 0x64b   :  { %4744 = vmatprep.subr.bf16.mxu0 %v4743_v34 }
 0x64e   :  { %4746 = vmatpush3.bf16.msra.mxu0 %v4743_v34  ;;  %v4183_v34 = vld [vmem:[%s5727_s2 + $0x80] sm:$0xff] }
 0x64f   :  { %4748 = vmatprep.subr.bf16.mxu0 %v4747_v41  ;;  %v4759_v40 = vpack.c.bf16 %v4184_v36, %v4183_v34 }
 0x652   :  { %4750 = vmatpush3.bf16.msra.mxu0 %v4747_v41 }
 0x718   :  { %v4510_v17 = vpop.f32.mrb[16].mxu0 }
 0x719   :  { %v1844_v15 = vadd.f32 %v4510_v17, %v4166_v47  ;;  %v1838_v48 = vpop.f32.mrb[17].mxu0 }
 0x71a   :  { %v1839_v49 = vadd.f32 %v4166_v47, %v1838_v48 }
 0x71b   :  { %v5382_v50 = vadd.f32 %v1844_v15, %v5166_v1 }
 0x71c   :  { %v5385_v51 = vadd.f32 %v1839_v49, %v5164_v0 }
 0x71d   :  { %v1852_v52 = vsel %vm94_vm0, %v5382_v50, 0.0 }
 0x71e   :  { %1853 = vadd.xlane.f32.xlu1 %v1852_v52  ;;  %v1849_v54 = vsel %vm94_vm0, %v5385_v51, 0.0 }
 0x71f   :  { %1850 = vadd.xlane.f32.xlu0 %v1849_v54 }
 0x7ab   :  { %v1854_v55 = vpop.xlane.xlu1 %1853 }
 0x7ac   :  { %v1856_v56 = vmul.f32 0.03125, %v1854_v55  ;;  %v1851_v57 = vpop.xlane.xlu0 %1850 }
 0x7ad   :  { %v1855_v58 = vmul.f32 0.03125, %v1851_v57 }
 0x7ae   :  { %v1858_v59 = vsub.f32 %v5382_v50, %v1856_v56 }
 0x7af   :  { %v1857_v1 = vsub.f32 %v5385_v51, %v1855_v58 }
 0x7b0   :  { %v1860_v61 = vmul.f32 %v1858_v59, %v1858_v59 }
 0x7b1   :  { %v1859_v60 = vmul.f32 %v1857_v1, %v1857_v1 }
 0x7b2   :  { %v1864_v62 = vsel %vm94_vm0, %v1860_v61, 0.0 }
 0x7b3   :  { %v1861_v0 = vsel %vm94_vm0, %v1859_v60, 0.0 }
 0x7b4   :  { %1862 = vadd.xlane.f32.xlu0 %v1861_v0 }
 0x7b8   :  { %1865 = vadd.xlane.f32.xlu0 %v1864_v62 }
 0x841   :  { %v1863_v7 = vpop.xlane.xlu0 %1862 }
 0x842   :  { %v1867_v8 = vmul.f32 0.03125, %v1863_v7 }
 0x844   :  { %v1869_v9 = vadd.f32 1e-06, %v1867_v8 }
 0x845   :  { %v1866_v10 = vpop.xlane.xlu0 %1865 }
 0x846   :  { %4859 = vrsqrt.f32 %v1869_v9  ;;  %v1868_v11 = vmul.f32 0.03125, %v1866_v10 }
 0x848   :  { %v1870_v12 = vadd.f32 1e-06, %v1868_v11 }
 0x84a   :  { %4861 = vrsqrt.f32 %v1870_v12 }
 0x850   :  { %v4860_v18 = vpop.eup %4859 }
 0x851   :  { %v1873_v19 = vmul.f32 %v4860_v18, %v1857_v1 }
 0x853   :  { %v1879_v21 = vmul.f32 %v1878_v16, %v1873_v19 }
 0x854   :  { %v4862_v22 = vpop.eup %4861 }
 0x855   :  { %v1874_v23 = vmul.f32 %v4862_v22, %v1858_v59  ;;  %v1885_v24 = vadd.f32 %v1884_v20, %v1879_v21 }
 0x857   :  { %v1880_v25 = vmul.f32 %v1878_v16, %v1874_v23  ;;  %4519 = vmatprep.mubr.msk.f32.mxu1 %vm94_vm0, %v1885_v24  ;;  %v4175_v23 = vld [vmem:[%s5727_s2 + $0x60] sm:$0xff]  ;;  %v4176_v24 = vld [vmem:[%s5727_s2 + $0x68] sm:$0xff] }
 0x859   :  { %v1886_v26 = vadd.f32 %v1884_v20, %v1880_v25  ;;  %v4751_v25 = vpack.c.bf16 %v4176_v24, %v4175_v23 }
 0x85b   :  { %4520 = vmatmul.mubr.msk.f32.vlgmr.msra.gmra.mrb[22].mxu1 %vm94_vm0, %v1886_v26  ;;  %v4191_v26 = vld [vmem:[%s5727_s2 + $0xa0] sm:$0xff]  ;;  %4752 = vmatprep.subr.bf16.mxu1 %v4751_v25 }
 0x85c   :  { %v4767_v28 = vpack.c.bf16 %v4192_v27, %v4191_v26  ;;  %4754 = vmatpush3.bf16.msra.mxu1 %v4751_v25 }
 0x85d   :  { %4756 = vmatprep.subr.bf16.mxu1 %v4755_v31 }
 0x85e   :  { %4768 = vmatprep.subr.bf16.mxu0 %v4767_v28 }
 0x860   :  { %4758 = vmatpush3.bf16.msra.mxu1 %v4755_v31 }
 0x861   :  { %4760 = vmatprep.subr.bf16.mxu1 %v4759_v40 }
 0x92e   :  { %v4521_v43 = vpop.f32.mrb[22].mxu1 }
 0x92f   :  { %v1976_v44 = vadd.f32 %v4521_v43, %v4169_v42  ;;  %v1970_v45 = vpop.f32.mrb[23].mxu1 }
 0x930   :  { %v1971_v46 = vadd.f32 %v4169_v42, %v1970_v45 }
 0x931   :  { %v1982_v47 = vmul.f32 0.044715, %v1976_v44  ;;  %v1980_v61 = vmul.f32 0.5, %v1976_v44 }
 0x932   :  { %v1981_v17 = vmul.f32 0.044715, %v1971_v46  ;;  %v1979_v60 = vmul.f32 0.5, %v1971_v46 }
 0x933   :  { %v1984_v15 = vmul.f32 %v1982_v47, %v1976_v44  ;;  %v5482_v47 = vld [vmem:[#allocation5 + $0x4] sm:$0xf] }
 0x934   :  { %v1983_v48 = vmul.f32 %v1981_v17, %v1971_v46  ;;  %v2127_v17 = vrot.slane %v5482_v47, %v124_v37 }
 0x935   :  { %v1986_v49 = vmul.f32 %v1984_v15, %v1976_v44 }
 0x936   :  { %v1985_v52 = vmul.f32 %v1983_v48, %v1971_v46 }
 0x937   :  { %v1988_v54 = vadd.f32 %v1986_v49, %v1976_v44 }
 0x938   :  { %v1987_v55 = vadd.f32 %v1985_v52, %v1971_v46 }
 0x939   :  { %v1990_v56 = vmul.f32 0.7978846, %v1988_v54  ;;  %v2133_v54 = vrot.slane %v5482_v47, %v130_v39  ;;  %v4180_v39 = vld [vmem:[%s5728_s3 + $0x3] ss:$0 sm:$0xff] }
 0x93a   :  { %v1989_v57 = vmul.f32 0.7978846, %v1987_v55 }
 0x93b   :  { %4863 = vtanh.f32 %v1990_v56 }
 0x93c   :  { %4865 = vtanh.f32 %v1989_v57  ;;  %v4185_v57 = vld [vmem:[%s5727_s2 + $0x90] sm:$0xff] }
 0x945   :  { %v4864_v58 = vpop.eup %4863 }
 0x946   :  { %v4866_v59 = vpop.eup %4865  ;;  %v1994_v1 = vadd.f32 1.0, %v4864_v58  ;;  %v4186_v58 = vld [vmem:[%s5727_s2 + $0x98] sm:$0xff] }
 0x947   :  { %v1993_v0 = vadd.f32 1.0, %v4866_v59 }
 0x948   :  { %v1996_v63 = vmul.f32 %v1994_v1, %v1980_v61  ;;  %v4763_v1 = vpack.c.bf16 %v4186_v58, %v4185_v57 }
 0x949   :  { %v1995_v62 = vmul.f32 %v1993_v0, %v1979_v60 }
 0x94b   :  { %4538 = vmatprep.mubr.msk.f32.mxu0 %vm2012_vm5, %v1995_v62 }
 0x94c   :  { %4539 = vmatmul.mubr.msk.f32.vlgmr.msra.gmra.mrb[18].mxu0 %vm2012_vm5, %v1996_v63 }
 0x94d   :  { %4770 = vmatpush3.bf16.msra.mxu0 %v4767_v28 }
 0x94e   :  { %4772 = vmatprep.subr.bf16.mxu0 %v4771_v33 }
 0x951   :  { %4774 = vmatpush3.bf16.msra.mxu0 %v4771_v33 }
 0x952   :  { %4584 = vmatprep.subr.mxu0 %v5037_v53 }
 0xa1f   :  { %v4540_v3 = vpop.f32.mrb[18].mxu0 }
 0xa20   :  { %v2091_v4 = vadd.f32 %v4540_v3, %v4172_v2  ;;  %v2085_v5 = vpop.f32.mrb[19].mxu0  ;;  %v4188_v3 = vld [vmem:[%s5728_s3 + $0x4] ss:$0 sm:$0xff] }
 0xa21   :  { %v2086_v6 = vadd.f32 %v4172_v2, %v2085_v5 }
 0xa22   :  { %v5438_v7 = vadd.f32 %v2091_v4, %v5382_v50 }
 0xa23   :  { %v5441_v8 = vadd.f32 %v2086_v6, %v5385_v51 }
 0xa24   :  { %v2101_v9 = vsel %vm94_vm0, %v5438_v7, 0.0 }
 0xa25   :  { %2102 = vadd.xlane.f32.xlu1 %v2101_v9  ;;  %v2098_v10 = vsel %vm94_vm0, %v5441_v8, 0.0 }
 0xa26   :  { %2099 = vadd.xlane.f32.xlu0 %v2098_v10 }
 0xab2   :  { %v2103_v11 = vpop.xlane.xlu1 %2102 }
 0xab3   :  { %v2105_v12 = vmul.f32 0.03125, %v2103_v11  ;;  %v2100_v16 = vpop.xlane.xlu0 %2099 }
 0xab4   :  { %v2104_v18 = vmul.f32 0.03125, %v2100_v16 }
 0xab5   :  { %v2107_v19 = vsub.f32 %v5438_v7, %v2105_v12 }
 0xab6   :  { %v2106_v50 = vsub.f32 %v5441_v8, %v2104_v18 }
 0xab7   :  { %v2109_v20 = vmul.f32 %v2107_v19, %v2107_v19 }
 0xab8   :  { %v2108_v21 = vmul.f32 %v2106_v50, %v2106_v50 }
 0xab9   :  { %v2113_v51 = vsel %vm94_vm0, %v2109_v20, 0.0 }
 0xaba   :  { %2114 = vadd.xlane.f32.xlu1 %v2113_v51  ;;  %v2110_v22 = vsel %vm94_vm0, %v2108_v21, 0.0  ;;  %v4196_v51 = vld [vmem:[%s5728_s3 + $0x5] ss:$0 sm:$0xff] }
 0xabb   :  { %2111 = vadd.xlane.f32.xlu0 %v2110_v22 }
 0xb47   :  { %v2115_v41 = vpop.xlane.xlu1 %2114 }
 0xb48   :  { %v2117_v42 = vmul.f32 0.03125, %v2115_v41  ;;  %v2112_v43 = vpop.xlane.xlu0 %2111 }
 0xb49   :  { %v2116_v44 = vmul.f32 0.03125, %v2112_v43 }
 0xb4a   :  { %v2119_v45 = vadd.f32 1e-06, %v2117_v42 }
 0xb4b   :  { %v2118_v46 = vadd.f32 1e-06, %v2116_v44 }
 0xb4c   :  { %4867 = vrsqrt.f32 %v2119_v45 }
 0xb4d   :  { %4869 = vrsqrt.f32 %v2118_v46 }
 0xb56   :  { %v4868_v15 = vpop.eup %4867 }
 0xb57   :  { %v4870_v48 = vpop.eup %4869  ;;  %v2123_v49 = vmul.f32 %v4868_v15, %v2107_v19 }
 0xb58   :  { %v2122_v52 = vmul.f32 %v4870_v48, %v2106_v50 }
 0xb59   :  { %v2129_v55 = vmul.f32 %v2127_v17, %v2123_v49 }
 0xb5a   :  { %v2128_v56 = vmul.f32 %v2127_v17, %v2122_v52 }
 0xb5b   :  { %v2135_v37 = vadd.f32 %v2133_v54, %v2129_v55 }
 0xb5c   :  { %v2134_v59 = vadd.f32 %v2133_v54, %v2128_v56 }
 0xb5e   :  { %4549 = vmatprep.mubr.msk.f32.mxu1 %vm94_vm0, %v2134_v59  ;;  %4571 = vmatprep.mubr.msk.f32.mxu0 %vm94_vm0, %v2134_v59 }
 0xb5f   :  { %4550 = vmatmul.mubr.msk.f32.vlgmr.msra.gmra.mrb[24].mxu1 %vm94_vm0, %v2135_v37  ;;  %4572 = vmatmul.mubr.msk.f32.vlgmr.msra.gmra.mrb[20].mxu0 %vm94_vm0, %v2135_v37 }
 0xb60   :  { %4762 = vmatpush3.bf16.msra.mxu1 %v4759_v40  ;;  %4560 = vmatprep.mubr.msk.f32.mxu1 %vm94_vm0, %v2134_v59 }
 0xb61   :  { %4764 = vmatprep.subr.bf16.mxu1 %v4763_v1  ;;  %4586 = vmatprep.mubr.msk.f32.mxu0 %vm5038_vm1, %v5037_v53 }
 0xb64   :  { %4766 = vmatpush3.bf16.msra.mxu1 %v4763_v1 }
 0xb65   :  { %4574 = vmatprep.subr.mxu1 %v5037_v53 }
 0xb67   :  { %4561 = vmatmul.mubr.msk.f32.vlgmr.msra.gmra.mrb[26].mxu1 %vm94_vm0, %v2135_v37 }
 0xb68   :  { %4576 = vmatprep.mubr.msk.f32.mxu1 %vm5038_vm1, %v5037_v53 }
 0xc32   :  { %v4551_v60 = vpop.f32.mrb[24].mxu1  ;;  %v5510_v0 = vpop.f32.mrb[20].mxu0 }
 0xc33   :  { %v2227_v61 = vadd.f32 %v4551_v60, %v4180_v39  ;;  %v2221_v62 = vpop.f32.mrb[25].mxu1  ;;  %v2397_v63 = vpop.f32.mrb[21].mxu0  ;;  %v5571_v25 = vadd.f32 %v5510_v0, %v4196_v51 }
 0xc34   :  { %v2222_v2 = vadd.f32 %v4180_v39, %v2221_v62  ;;  %v5560_v23 = vadd.f32 %v4196_v51, %v2397_v63 }
 0xc35   :  { %2414 = vrot.lane.b32.xlu1 %v2227_v61, %s5039_s26 }
 0xc36   :  { %2426 = vrot.lane.b32.xlu0 %v2222_v2, %s5040_s27 }
 0xc39   :  { %2428 = vrot.lane.b32.xlu1 %v2227_v61, %s5040_s27 }
 0xc3a   :  { %v4562_v4 = vpop.f32.mrb[26].mxu1 }
 0xc3b   :  { %v2309_v5 = vpop.f32.mrb[27].mxu1  ;;  %v2315_v9 = vadd.f32 %v4562_v4, %v4188_v3 }
 0xc3c   :  { %v2310_v6 = vadd.f32 %v4188_v3, %v2309_v5 }
 0xc3d   :  { %2412 = vrot.lane.b32.xlu1 %v2222_v2, %s5039_s26 }
 0xc3e   :  { %4575 = vmatpush3.xpose.msk.msra.mxu1 %vm450_vm2, %v2310_v6  ;;  %2416 = vrot.lane.b32.xlu0 %v2310_v6, %s5039_s26 }
 0xc3f   :  { %4579 = vmatprep.subr.mxu1 %v5037_v53 }
 0xc41   :  { %4577 = vmatmul.mubr.msk.f32.vlgmr.msra.gmra.mrb[28].mxu1 %vm450_vm2, %v2222_v2  ;;  %2418 = vrot.lane.b32.xlu1 %v2315_v9, %s5039_s26 }
 0xc42   :  { %2430 = vrot.lane.b32.xlu0 %v2310_v6, %s5040_s27  ;;  %4580 = vmatpush3.xpose.msk.msra.mxu1 %vm450_vm2, %v2315_v9 }
 0xc43   :  { %4581 = vmatprep.mubr.msk.f32.mxu1 %vm5038_vm1, %v5037_v53  ;;  %4589 = vmatprep.subr.mxu1 %v5037_v53 }
 0xc45   :  { %4582 = vmatmul.mubr.msk.f32.vlgmr.msra.gmra.mrb[30].mxu1 %vm450_vm2, %v2227_v61  ;;  %2432 = vrot.lane.b32.xlu1 %v2315_v9, %s5040_s27 }
 0xc46   :  { %2444 = vrot.lane.b32.xlu0 %v2310_v6, %s5041_s11  ;;  %4591 = vmatprep.mubr.msk.f32.mxu1 %vm5038_vm1, %v5037_v53 }
 0xc49   :  { %2446 = vrot.lane.b32.xlu1 %v2315_v9, %s5041_s11 }
 0xc4a   :  { %2440 = vrot.lane.b32.xlu0 %v2222_v2, %s5041_s11 }
 0xc4d   :  { %2442 = vrot.lane.b32.xlu1 %v2227_v61, %s5041_s11 }
 0xca7   :  { %v2415_v10 = vpop.permute.xlu1 %2414 }
 0xca8   :  { %v2427_v12 = vpop.permute.xlu0 %2426 }
 0xcab   :  { %v2429_v11 = vpop.permute.xlu1 %2428 }
 0xcaf   :  { %v2413_v16 = vpop.permute.xlu1 %2412 }
 0xcb0   :  { %v2417_v18 = vpop.permute.xlu0 %2416 }
 0xcb1   :  { %4585 = vmatpush3.xpose.msk.msra.mxu0 %vm450_vm2, %v2417_v18 }
 0xcb2   :  { %4594 = vmatprep.subr.mxu0 %v5037_v53 }
 0xcb3   :  { %v2419_v19 = vpop.permute.xlu1 %2418 }
 0xcb4   :  { %v2431_v50 = vpop.permute.xlu0 %2430  ;;  %4587 = vmatmul.mubr.msk.f32.vlgmr.msra.gmra.mrb[22].mxu0 %vm450_vm2, %v2413_v16  ;;  %4590 = vmatpush3.xpose.msk.msra.mxu1 %vm450_vm2, %v2419_v19 }
 0xcb5   :  { %4595 = vmatpush3.xpose.msk.msra.mxu0 %vm450_vm2, %v2431_v50  ;;  %4596 = vmatprep.mubr.msk.f32.mxu0 %vm5038_vm1, %v5037_v53 }
 0xcb6   :  { %4604 = vmatprep.subr.mxu0 %v5037_v53  ;;  %4599 = vmatprep.subr.mxu1 %v5037_v53 }
 0xcb7   :  { %v2433_v20 = vpop.permute.xlu1 %2432  ;;  %4592 = vmatmul.mubr.msk.f32.vlgmr.msra.gmra.mrb[32].mxu1 %vm450_vm2, %v2415_v10 }
 0xcb8   :  { %v2445_v21 = vpop.permute.xlu0 %2444  ;;  %4597 = vmatmul.mubr.msk.f32.vlgmr.msra.gmra.mrb[24].mxu0 %vm450_vm2, %v2427_v12  ;;  %4600 = vmatpush3.xpose.msk.msra.mxu1 %vm450_vm2, %v2433_v20 }
 0xcb9   :  { %4605 = vmatpush3.xpose.msk.msra.mxu0 %vm450_vm2, %v2445_v21  ;;  %4601 = vmatprep.mubr.msk.f32.mxu1 %vm5038_vm1, %v5037_v53 }
 0xcba   :  { %4606 = vmatprep.mubr.msk.f32.mxu0 %vm5038_vm1, %v5037_v53  ;;  %4614 = vmatprep.subr.mxu0 %v5037_v53 }
 0xcbb   :  { %v2447_v22 = vpop.permute.xlu1 %2446  ;;  %4602 = vmatmul.mubr.msk.f32.vlgmr.msra.gmra.mrb[34].mxu1 %vm450_vm2, %v2429_v11  ;;  %4609 = vmatprep.subr.mxu1 %v5037_v53 }
 0xcbc   :  { %v2441_v24 = vpop.permute.xlu0 %2440  ;;  %4610 = vmatpush3.xpose.msk.msra.mxu1 %vm450_vm2, %v2447_v22  ;;  %4611 = vmatprep.mubr.msk.f32.mxu1 %vm5038_vm1, %v5037_v53 }
 0xcbd   :  { %4607 = vmatmul.mubr.msk.f32.vlgmr.msra.gmra.mrb[26].mxu0 %vm450_vm2, %v2441_v24  ;;  %4619 = vmatprep.subr.mxu1 %v5037_v53 }
 0xcbe   :  { %4615 = vmatpush3.msra.mxu0 %v5560_v23  ;;  %4616 = vmatprep.mubr.msk.f32.mxu0 %vm5038_vm1, %v5037_v53 }
 0xcbf   :  { %v2443_v26 = vpop.permute.xlu1 %2442  ;;  %4624 = vmatprep.subr.mxu0 %v5037_v53 }
 0xcc0   :  { %4612 = vmatmul.mubr.msk.f32.vlgmr.msra.gmra.mrb[36].mxu1 %vm450_vm2, %v2443_v26 }
 0xcc1   :  { %4620 = vmatpush3.msra.mxu1 %v5571_v25  ;;  %4621 = vmatprep.mubr.msk.f32.mxu1 %vm5038_vm1, %v5037_v53 }
 0xcc2   :  { %4629 = vmatprep.subr.mxu1 %v5037_v53 }
 0xd14   :  { %v2524_v27 = vpop.f32.mrb[28].mxu1 }
 0xd15   :  { %v3046_v28 = vmul.f32 0.35355338, %v2524_v27  ;;  %v4578_v38 = vpop.f32.mrb[29].mxu1 }
 0xd17   :  { %v3054_v29 = vsel %vm450_vm2, %v3046_v28, -inf }
 0xd18   :  { %3055 = vmax.xlane.f32.xlu0 %v3054_v29  ;;  %v2598_v30 = vpop.f32.mrb[30].mxu1 }
 0xd19   :  { %v3047_v31 = vmul.f32 0.35355338, %v2598_v30  ;;  %v4583_v32 = vpop.f32.mrb[31].mxu1 }
 0xd1b   :  { %v3057_v33 = vsel %vm450_vm2, %v3047_v31, -inf }
 0xd1c   :  { %3058 = vmax.xlane.f32.xlu1 %v3057_v33 }
 0xd87   :  { %v2672_v34 = vpop.f32.mrb[22].mxu0 }
 0xd88   :  { %v4588_v36 = vpop.f32.mrb[23].mxu0  ;;  %v3048_v45 = vmul.f32 0.35355338, %v2672_v34 }
 0xd8a   :  { %v2746_v40 = vpop.f32.mrb[32].mxu1  ;;  %v3060_v55 = vsel %vm450_vm2, %v3048_v45, -inf }
 0xd8b   :  { %v3049_v41 = vmul.f32 0.35355338, %v2746_v40  ;;  %v2820_v42 = vpop.f32.mrb[24].mxu0  ;;  %v4593_v43 = vpop.f32.mrb[33].mxu1 }
 0xd8c   :  { %v4598_v44 = vpop.f32.mrb[25].mxu0  ;;  %v3050_v52 = vmul.f32 0.35355338, %v2820_v42 }
 0xd8d   :  { %v3063_v46 = vsel %vm450_vm2, %v3049_v41, -inf }
 0xd8e   :  { %3064 = vmax.xlane.f32.xlu0 %v3063_v46  ;;  %v2894_v17 = vpop.f32.mrb[34].mxu1  ;;  %v3066_v1 = vsel %vm450_vm2, %v3050_v52, -inf }
 0xd8f   :  { %v3051_v15 = vmul.f32 0.35355338, %v2894_v17  ;;  %v4603_v48 = vpop.f32.mrb[35].mxu1 }
 0xd90   :  { %v2968_v49 = vpop.f32.mrb[26].mxu0 }
 0xd91   :  { %v4608_v54 = vpop.f32.mrb[27].mxu0  ;;  %v3069_v56 = vsel %vm450_vm2, %v3051_v15, -inf  ;;  %v3052_v37 = vmul.f32 0.35355338, %v2968_v49 }
 0xd92   :  { %3061 = vmax.xlane.f32.xlu0 %v3060_v55  ;;  %3070 = vmax.xlane.f32.xlu1 %v3069_v56 }
 0xd93   :  { %v3042_v57 = vpop.f32.mrb[36].mxu1  ;;  %v3072_v60 = vsel %vm450_vm2, %v3052_v37, -inf }
 0xd94   :  { %v3053_v58 = vmul.f32 0.35355338, %v3042_v57  ;;  %v4613_v59 = vpop.f32.mrb[37].mxu1 }
 0xd96   :  { %3067 = vmax.xlane.f32.xlu0 %v3066_v1  ;;  %v3075_v39 = vsel %vm450_vm2, %v3053_v58, -inf }
 0xd97   :  { %3076 = vmax.xlane.f32.xlu1 %v3075_v39 }
 0xd9a   :  { %3073 = vmax.xlane.f32.xlu0 %v3072_v60 }
 0xda5   :  { %v3056_v0 = vpop.xlane.xlu0 %3055 }
 0xda6   :  { %v3078_v61 = vsub.f32 %v3046_v28, %v3056_v0 }
 0xda8   :  { %2422 = vrot.lane.b32.xlu1 %v5571_v25, %s5039_s26  ;;  %v3086_v63 = vmul.f32 1.442695, %v3078_v61 }
 0xda9   :  { %v3059_v62 = vpop.xlane.xlu1 %3058 }
 0xdaa   :  { %v3079_v2 = vsub.f32 %v3047_v31, %v3059_v62  ;;  %4871 = vpow2.f32 %v3086_v63 }
 0xdac   :  { %2434 = vrot.lane.b32.xlu1 %v5560_v23, %s5040_s27  ;;  %v3088_v3 = vmul.f32 1.442695, %v3079_v2 }
 0xdae   :  { %4873 = vpow2.f32 %v3088_v3 }
 0xdb0   :  { %2420 = vrot.lane.b32.xlu0 %v5560_v23, %s5039_s26  ;;  %2436 = vrot.lane.b32.xlu1 %v5571_v25, %s5040_s27 }
 0xdb4   :  { %v4872_v4 = vpop.eup %4871 }
 0xdb5   :  { %v3102_v5 = vsel %vm450_vm2, %v4872_v4, 0.0 }
 0xdb8   :  { %v4874_v6 = vpop.eup %4873 }
 0xdb9   :  { %v3105_v9 = vsel %vm450_vm2, %v4874_v6, 0.0 }
 0xdcf   :  { %3103 = vadd.xlane.f32.xlu0 %v3102_v5 }
 0xdd4   :  { %3106 = vadd.xlane.f32.xlu1 %v3105_v9 }
 0xe1b   :  { %v3065_v10 = vpop.xlane.xlu0 %3064 }
 0xe1c   :  { %v3081_v11 = vsub.f32 %v3049_v41, %v3065_v10 }
 0xe1e   :  { %v3092_v12 = vmul.f32 1.442695, %v3081_v11 }
 0xe1f   :  { %v3062_v16 = vpop.xlane.xlu0 %3061  ;;  %v3071_v18 = vpop.xlane.xlu1 %3070 }
 0xe20   :  { %4875 = vpow2.f32 %v3092_v12  ;;  %v3080_v19 = vsub.f32 %v3048_v45, %v3062_v16  ;;  %v3083_v50 = vsub.f32 %v3051_v15, %v3071_v18 }
 0xe22   :  { %v3090_v20 = vmul.f32 1.442695, %v3080_v19  ;;  %v3096_v21 = vmul.f32 1.442695, %v3083_v50 }
 0xe23   :  { %v3068_v51 = vpop.xlane.xlu0 %3067 }
 0xe24   :  { %4877 = vpow2.f32 %v3090_v20  ;;  %v3082_v22 = vsub.f32 %v3050_v52, %v3068_v51  ;;  %v3077_v24 = vpop.xlane.xlu1 %3076  ;;  %v3757_v20 = vld [vmem:[#allocation7 + $0x20] sm:$0xff] }
 0xe25   :  { %4879 = vpow2.f32 %v3096_v21  ;;  %v3085_v26 = vsub.f32 %v3053_v58, %v3077_v24  ;;  %v3758_v21 = vld [vmem:[#allocation7 + $0x28] sm:$0xff]  ;;  %v3760_v24 = vld [vmem:[#allocation7 + $0x38] sm:$0xff] }
 0xe26   :  { %v3094_v27 = vmul.f32 1.442695, %v3082_v22  ;;  %v4775_v51 = vpack.c.bf16 %v3758_v21, %v3757_v20  ;;  %v3759_v22 = vld [vmem:[#allocation7 + $0x30] sm:$0xff]  ;;  %v3881_v21 = vrot.slane %v5482_v47, %v1877_v13  ;;  %v4231_v13 = vld [vmem:[%s5733_s8 + $0x40] sm:$0xff] }
 0xe27   :  { %v3100_v28 = vmul.f32 1.442695, %v3085_v26  ;;  %v3074_v38 = vpop.xlane.xlu0 %3073  ;;  %v4779_v26 = vpack.c.bf16 %v3760_v24, %v3759_v22  ;;  %v3887_v24 = vrot.slane %v5482_v47, %v1883_v14  ;;  %v4233_v14 = vld [vmem:[%s5733_s8 + $0x50] sm:$0xff]  ;;  %v4791_v47 = vpack.c.bf16 %v4232_v35, %v4231_v13 }
 0xe28   :  { %4881 = vpow2.f32 %v3094_v27  ;;  %v3084_v29 = vsub.f32 %v3052_v37, %v3074_v38  ;;  %v2423_v17 = vpop.permute.xlu1 %2422 }
 0xe29   :  { %4883 = vpow2.f32 %v3100_v28 }
 0xe2a   :  { %v4876_v30 = vpop.eup %4875  ;;  %v3098_v31 = vmul.f32 1.442695, %v3084_v29 }
 0xe2b   :  { %v3111_v32 = vsel %vm450_vm2, %v4876_v30, 0.0  ;;  %v2421_v48 = vpop.permute.xlu0 %2420 }
 0xe2c   :  { %4885 = vpow2.f32 %v3098_v31  ;;  %3112 = vadd.xlane.f32.xlu1 %v3111_v32  ;;  %v2435_v15 = vpop.permute.xlu1 %2434 }
 0xe2e   :  { %v4878_v33 = vpop.eup %4877 }
 0xe2f   :  { %v4880_v34 = vpop.eup %4879  ;;  %v3108_v36 = vsel %vm450_vm2, %v4878_v33, 0.0 }
 0xe30   :  { %3109 = vadd.xlane.f32.xlu0 %v3108_v36  ;;  %v3117_v40 = vsel %vm450_vm2, %v4880_v34, 0.0  ;;  %v2437_v52 = vpop.permute.xlu1 %2436 }
 0xe31   :  { %3118 = vadd.xlane.f32.xlu1 %v3117_v40 }
 0xe32   :  { %v4882_v41 = vpop.eup %4881 }
 0xe33   :  { %v4884_v42 = vpop.eup %4883  ;;  %v3114_v43 = vsel %vm450_vm2, %v4882_v41, 0.0 }
 0xe34   :  { %3115 = vadd.xlane.f32.xlu0 %v3114_v43  ;;  %v3123_v44 = vsel %vm450_vm2, %v4884_v42, 0.0 }
 0xe35   :  { %3124 = vadd.xlane.f32.xlu1 %v3123_v44 }
 0xe36   :  { %v5602_v45 = vpop.eup %4885 }
 0xe37   :  { %v3120_v46 = vsel %vm450_vm2, %v5602_v45, 0.0 }
 0xe38   :  { %3121 = vadd.xlane.f32.xlu0 %v3120_v46 }
 0xe46   :  { %2450 = vrot.lane.b32.xlu1 %v5571_v25, %s5041_s11 }
 0xe4e   :  { %2448 = vrot.lane.b32.xlu0 %v5560_v23, %s5041_s11 }
 0xe5c   :  { %v3104_v49 = vpop.xlane.xlu0 %3103 }
 0xe5d   :  { %4887 = vrcp.f32 %v3104_v49 }
 0xe61   :  { %v3107_v54 = vpop.xlane.xlu1 %3106 }
 0xe62   :  { %4889 = vrcp.f32 %v3107_v54 }
 0xe67   :  { %v4888_v55 = vpop.eup %4887 }
 0xe68   :  { %v3134_v56 = vmul.f32 %v4888_v55, %v4872_v4  ;;  %v4224_v55 = vld [vmem:[%s5730_s5 + $0x1] ss:$0 sm:$0xff] }
 0xe6a   :  { %4617 = vmatmul.mubr.msk.f32.vlgmr.msra.gmra.mrb[28].mxu0 %vm450_vm2, %v3134_v56 }
 0xe6b   :  { %4625 = vmatpush3.msra.mxu0 %v2421_v48  ;;  %4626 = vmatprep.mubr.msk.f32.mxu0 %vm5038_vm1, %v5037_v53 }
 0xe6c   :  { %v4890_v25 = vpop.eup %4889  ;;  %4634 = vmatprep.subr.mxu0 %v5037_v53 }
 0xe6d   :  { %v3135_v23 = vmul.f32 %v4890_v25, %v4874_v6 }
 0xe6f   :  { %4622 = vmatmul.mubr.msk.f32.vlgmr.msra.gmra.mrb[38].mxu1 %vm450_vm2, %v3135_v23 }
 0xe70   :  { %4630 = vmatpush3.msra.mxu1 %v2423_v17  ;;  %4631 = vmatprep.mubr.msk.f32.mxu1 %vm5038_vm1, %v5037_v53 }
 0xe71   :  { %4639 = vmatprep.subr.mxu1 %v5037_v53 }
 0xeb9   :  { %v3113_v57 = vpop.xlane.xlu1 %3112 }
 0xeba   :  { %4891 = vrcp.f32 %v3113_v57 }
 0xebd   :  { %v3110_v58 = vpop.xlane.xlu0 %3109 }
 0xebe   :  { %4893 = vrcp.f32 %v3110_v58  ;;  %v3119_v59 = vpop.xlane.xlu1 %3118 }
 0xebf   :  { %4895 = vrcp.f32 %v3119_v59 }
 0xec1   :  { %v3116_v37 = vpop.xlane.xlu0 %3115 }
 0xec2   :  { %4897 = vrcp.f32 %v3116_v37  ;;  %v3125_v1 = vpop.xlane.xlu1 %3124 }
 0xec3   :  { %4899 = vrcp.f32 %v3125_v1 }
 0xec4   :  { %v4892_v39 = vpop.eup %4891 }
 0xec5   :  { %v3137_v60 = vmul.f32 %v4892_v39, %v4876_v30  ;;  %v3122_v0 = vpop.xlane.xlu0 %3121 }
 0xec6   :  { %4901 = vrcp.f32 %v3122_v0  ;;  %v2451_v4 = vpop.permute.xlu1 %2450 }
 0xec7   :  { %4632 = vmatmul.mubr.msk.f32.vlgmr.msra.gmra.mrb[40].mxu1 %vm450_vm2, %v3137_v60 }
 0xec8   :  { %v4894_v61 = vpop.eup %4893  ;;  %4640 = vmatpush3.msra.mxu1 %v2437_v52  ;;  %4641 = vmatprep.mubr.msk.f32.mxu1 %vm5038_vm1, %v5037_v53 }
 0xec9   :  { %v4896_v62 = vpop.eup %4895  ;;  %v3136_v63 = vmul.f32 %v4894_v61, %v4878_v33  ;;  %4649 = vmatprep.subr.mxu1 %v5037_v53  ;;  %v2449_v10 = vpop.permute.xlu0 %2448 }
 0xeca   :  { %v3139_v2 = vmul.f32 %v4896_v62, %v4880_v34 }
 0xecb   :  { %4627 = vmatmul.mubr.msk.f32.vlgmr.msra.gmra.mrb[30].mxu0 %vm450_vm2, %v3136_v63 }
 0xecc   :  { %v4898_v3 = vpop.eup %4897  ;;  %4635 = vmatpush3.msra.mxu0 %v2435_v15  ;;  %4642 = vmatmul.mubr.msk.f32.vlgmr.msra.gmra.mrb[42].mxu1 %vm450_vm2, %v3139_v2 }
 0xecd   :  { %v4900_v5 = vpop.eup %4899  ;;  %v3138_v6 = vmul.f32 %v4898_v3, %v4882_v41  ;;  %4650 = vmatpush3.msra.mxu1 %v2451_v4  ;;  %4636 = vmatprep.mubr.msk.f32.mxu0 %vm5038_vm1, %v5037_v53  ;;  %v3891_v4 = vld [vmem:[#allocation8 + $0x20] sm:$0xff] }
 0xece   :  { %v3141_v9 = vmul.f32 %v4900_v5, %v4884_v42  ;;  %4644 = vmatprep.subr.mxu0 %v5037_v53  ;;  %4651 = vmatprep.mubr.msk.f32.mxu1 %vm5038_vm1, %v5037_v53  ;;  %v3892_v5 = vld [vmem:[#allocation8 + $0x28] sm:$0xff] }
 0xecf   :  { %4637 = vmatmul.mubr.msk.f32.vlgmr.msra.gmra.mrb[32].mxu0 %vm450_vm2, %v3138_v6  ;;  %v4783_v6 = vpack.c.bf16 %v3892_v5, %v3891_v4 }
 0xed0   :  { %v4902_v11 = vpop.eup %4901  ;;  %4645 = vmatpush3.msra.mxu0 %v2449_v10  ;;  %4652 = vmatmul.mubr.msk.f32.vlgmr.msra.gmra.mrb[44].mxu1 %vm450_vm2, %v3141_v9  ;;  %v3893_v9 = vld [vmem:[#allocation8 + $0x30] sm:$0xff]  ;;  %v3894_v10 = vld [vmem:[#allocation8 + $0x38] sm:$0xff] }
 0xed1   :  { %v3140_v12 = vmul.f32 %v4902_v11, %v5602_v45  ;;  %4646 = vmatprep.mubr.msk.f32.mxu0 %vm5038_vm1, %v5037_v53  ;;  %4776 = vmatprep.subr.bf16.mxu0 %v4775_v51  ;;  %v4787_v11 = vpack.c.bf16 %v3894_v10, %v3893_v9 }
 0xed2   :  { %4784 = vmatprep.subr.bf16.mxu1 %v4783_v6 }
 0xed3   :  { %4647 = vmatmul.mubr.msk.f32.vlgmr.msra.gmra.mrb[34].mxu0 %vm450_vm2, %v3140_v12  ;;  %4786 = vmatpush3.bf16.msra.mxu1 %v4783_v6 }
 0xed4   :  { %4778 = vmatpush3.bf16.msra.mxu0 %v4775_v51  ;;  %4788 = vmatprep.subr.bf16.mxu1 %v4787_v11 }
 0xed5   :  { %4780 = vmatprep.subr.bf16.mxu0 %v4779_v26 }
 0xed7   :  { %4790 = vmatpush3.bf16.msra.mxu1 %v4787_v11 }
 0xed8   :  { %4782 = vmatpush3.bf16.msra.mxu0 %v4779_v26 }
 0xed9   :  { %4792 = vmatprep.subr.bf16.mxu0 %v4791_v47 }
 0xf3d   :  { %v3211_v16 = vpop.f32.mrb[28].mxu0 }
 0xf3e   :  { %v4618_v18 = vpop.f32.mrb[29].mxu0 }
 0xf42   :  { %v3284_v19 = vpop.f32.mrb[38].mxu1 }
 0xf43   :  { %v4623_v50 = vpop.f32.mrb[39].mxu1 }
 0xf9a   :  { %v3430_v27 = vpop.f32.mrb[40].mxu1 }
 0xf9b   :  { %3730 = vrot.lane.b32.xlu1 %v3430_v27, %s5034_s14  ;;  %v4633_v28 = vpop.f32.mrb[41].mxu1 }
 0xf9e   :  { %v3357_v53 = vpop.f32.mrb[30].mxu0 }
 0xf9f   :  { %v3576_v38 = vpop.f32.mrb[42].mxu1  ;;  %3728 = vrot.lane.b32.xlu0 %v3357_v53, %s5034_s14  ;;  %v4628_v29 = vpop.f32.mrb[31].mxu0 }
 0xfa0   :  { %3738 = vrot.lane.b32.xlu1 %v3576_v38, %s5042_s12  ;;  %v4643_v30 = vpop.f32.mrb[43].mxu1 }
 0xfa1   :  { %v4234_v30 = vld [vmem:[%s5733_s8 + $0x58] sm:$0xff] }
 0xfa2   :  { %v3503_v31 = vpop.f32.mrb[32].mxu0 }
 0xfa3   :  { %3736 = vrot.lane.b32.xlu0 %v3503_v31, %s5042_s12  ;;  %v4638_v32 = vpop.f32.mrb[33].mxu0  ;;  %v3722_v33 = vpop.f32.mrb[44].mxu1  ;;  %v4795_v31 = vpack.c.bf16 %v4234_v30, %v4233_v14 }
 0xfa4   :  { %3746 = vrot.lane.b32.xlu1 %v3722_v33, %s5043_s13  ;;  %v4653_v34 = vpop.f32.mrb[45].mxu1  ;;  %v4235_v32 = vld [vmem:[%s5733_s8 + $0x60] sm:$0xff]  ;;  %v4236_v33 = vld [vmem:[%s5733_s8 + $0x68] sm:$0xff] }
 0xfa5   :  { %v4799_v34 = vpack.c.bf16 %v4236_v33, %v4235_v32 }
 0xfa6   :  { %v3649_v36 = vpop.f32.mrb[34].mxu0 }
 0xfa7   :  { %3744 = vrot.lane.b32.xlu0 %v3649_v36, %s5043_s13  ;;  %v4648_v40 = vpop.f32.mrb[35].mxu0  ;;  %v4237_v36 = vld [vmem:[%s5733_s8 + $0x70] sm:$0xff] }
 0xfa8   :  { %v4238_v40 = vld [vmem:[%s5733_s8 + $0x78] sm:$0xff] }
0x100d   :  { %v3731_v41 = vpop.permute.xlu1 %3730 }
0x100e   :  { %v3751_v17 = vsel %vm450_vm2, %v3284_v19, %v3731_v41  ;;  %v4803_v41 = vpack.c.bf16 %v4238_v40, %v4237_v36 }
0x1011   :  { %v3729_v42 = vpop.permute.xlu0 %3728 }
0x1012   :  { %v3739_v43 = vpop.permute.xlu1 %3738  ;;  %v3750_v45 = vsel %vm450_vm2, %v3211_v16, %v3729_v42  ;;  %v4228_v42 = vld [vmem:[%s5732_s7 + $0x1] ss:$0 sm:$0xff] }
0x1013   :  { %v3753_v49 = vsel %vm1749_vm3, %v3751_v17, %v3739_v43 }
0x1015   :  { %v3737_v44 = vpop.permute.xlu0 %3736 }
0x1016   :  { %v3747_v46 = vpop.permute.xlu1 %3746  ;;  %v3752_v15 = vsel %vm1749_vm3, %v3750_v45, %v3737_v44 }
0x1017   :  { %v3755_v54 = vsel %vm1752_vm4, %v3753_v49, %v3747_v46 }
0x1019   :  { %v3745_v48 = vpop.permute.xlu0 %3744 }
0x101a   :  { %v3754_v52 = vsel %vm1752_vm4, %v3752_v15, %v3745_v48 }
0x101b   :  { %4662 = vmatprep.mubr.msk.f32.mxu0 %vm94_vm0, %v3754_v52 }
0x101c   :  { %4663 = vmatmul.mubr.msk.f32.vlgmr.msra.gmra.mrb[36].mxu0 %vm94_vm0, %v3755_v54 }
0x101d   :  { %4794 = vmatpush3.bf16.msra.mxu0 %v4791_v47 }
0x101e   :  { %4796 = vmatprep.subr.bf16.mxu0 %v4795_v31 }
0x1021   :  { %4798 = vmatpush3.bf16.msra.mxu0 %v4795_v31 }
0x1022   :  { %4800 = vmatprep.subr.bf16.mxu0 %v4799_v34 }
0x1025   :  { %4802 = vmatpush3.bf16.msra.mxu0 %v4799_v34 }
0x1026   :  { %4804 = vmatprep.subr.bf16.mxu0 %v4803_v41 }
0x1029   :  { %4806 = vmatpush3.bf16.msra.mxu0 %v4803_v41 }
0x10ef   :  { %v4664_v56 = vpop.f32.mrb[36].mxu0 }
0x10f0   :  { %v3847_v25 = vadd.f32 %v4664_v56, %v4224_v55  ;;  %v3841_v23 = vpop.f32.mrb[37].mxu0 }
0x10f1   :  { %v3842_v57 = vadd.f32 %v4224_v55, %v3841_v23 }
0x10f2   :  { %v5653_v58 = vadd.f32 %v3847_v25, %v5438_v7 }
0x10f3   :  { %v5656_v59 = vadd.f32 %v3842_v57, %v5441_v8 }
0x10f4   :  { %v3855_v37 = vsel %vm94_vm0, %v5653_v58, 0.0 }
0x10f5   :  { %3856 = vadd.xlane.f32.xlu1 %v3855_v37  ;;  %v3852_v1 = vsel %vm94_vm0, %v5656_v59, 0.0 }
0x10f6   :  { %3853 = vadd.xlane.f32.xlu0 %v3852_v1 }
0x1182   :  { %v3857_v39 = vpop.xlane.xlu1 %3856 }
0x1183   :  { %v3859_v60 = vmul.f32 0.03125, %v3857_v39  ;;  %v3854_v0 = vpop.xlane.xlu0 %3853 }
0x1184   :  { %v3858_v61 = vmul.f32 0.03125, %v3854_v0 }
0x1185   :  { %v3861_v62 = vsub.f32 %v5653_v58, %v3859_v60 }
0x1186   :  { %v3860_v7 = vsub.f32 %v5656_v59, %v3858_v61 }
0x1187   :  { %v3863_v2 = vmul.f32 %v3861_v62, %v3861_v62 }
0x1188   :  { %v3862_v63 = vmul.f32 %v3860_v7, %v3860_v7 }
0x1189   :  { %v3867_v3 = vsel %vm94_vm0, %v3863_v2, 0.0 }
0x118a   :  { %v3864_v8 = vsel %vm94_vm0, %v3862_v63, 0.0 }
0x118b   :  { %3865 = vadd.xlane.f32.xlu0 %v3864_v8 }
0x118f   :  { %3868 = vadd.xlane.f32.xlu0 %v3867_v3 }
0x1218   :  { %v3866_v12 = vpop.xlane.xlu0 %3865 }
0x1219   :  { %v3870_v16 = vmul.f32 0.03125, %v3866_v12 }
0x121b   :  { %v3872_v18 = vadd.f32 1e-06, %v3870_v16 }
0x121c   :  { %v3869_v19 = vpop.xlane.xlu0 %3868 }
0x121d   :  { %4903 = vrsqrt.f32 %v3872_v18  ;;  %v3871_v50 = vmul.f32 0.03125, %v3869_v19 }
0x121f   :  { %v3873_v20 = vadd.f32 1e-06, %v3871_v50 }
0x1221   :  { %4905 = vrsqrt.f32 %v3873_v20 }
0x1227   :  { %v4904_v51 = vpop.eup %4903 }
0x1228   :  { %v3876_v22 = vmul.f32 %v4904_v51, %v3860_v7  ;;  %v4240_v7 = vld [vmem:[%s5734_s9 + $0x1] ss:$0 sm:$0xff] }
0x122a   :  { %v3882_v26 = vmul.f32 %v3881_v21, %v3876_v22 }
0x122b   :  { %v4906_v27 = vpop.eup %4905 }
0x122c   :  { %v3877_v28 = vmul.f32 %v4906_v27, %v3861_v62  ;;  %v3888_v53 = vadd.f32 %v3887_v24, %v3882_v26 }
0x122e   :  { %v3883_v38 = vmul.f32 %v3881_v21, %v3877_v28  ;;  %4673 = vmatprep.mubr.msk.f32.mxu1 %vm94_vm0, %v3888_v53 }
0x1230   :  { %v3889_v29 = vadd.f32 %v3887_v24, %v3883_v38 }
0x1232   :  { %4674 = vmatmul.mubr.msk.f32.vlgmr.msra.gmra.mrb[46].mxu1 %vm94_vm0, %v3889_v29 }
0x1305   :  { %v4675_v43 = vpop.f32.mrb[46].mxu1 }
0x1306   :  { %v3981_v44 = vadd.f32 %v4675_v43, %v4228_v42  ;;  %v3975_v45 = vpop.f32.mrb[47].mxu1 }
0x1307   :  { %v3976_v46 = vadd.f32 %v4228_v42, %v3975_v45 }
0x1308   :  { %v3987_v17 = vmul.f32 0.044715, %v3981_v44  ;;  %v3985_v0 = vmul.f32 0.5, %v3981_v44 }
0x1309   :  { %v3986_v15 = vmul.f32 0.044715, %v3976_v46  ;;  %v3984_v39 = vmul.f32 0.5, %v3976_v46 }
0x130a   :  { %v3989_v48 = vmul.f32 %v3987_v17, %v3981_v44 }
0x130b   :  { %v3988_v49 = vmul.f32 %v3986_v15, %v3976_v46 }
0x130c   :  { %v3991_v52 = vmul.f32 %v3989_v48, %v3981_v44 }
0x130d   :  { %v3990_v54 = vmul.f32 %v3988_v49, %v3976_v46 }
0x130e   :  { %v3993_v55 = vadd.f32 %v3991_v52, %v3981_v44 }
0x130f   :  { %v3992_v56 = vadd.f32 %v3990_v54, %v3976_v46 }
0x1310   :  { %v3995_v25 = vmul.f32 0.7978846, %v3993_v55 }
0x1311   :  { %v3994_v23 = vmul.f32 0.7978846, %v3992_v56 }
0x1312   :  { %4907 = vtanh.f32 %v3995_v25 }
0x1313   :  { %4909 = vtanh.f32 %v3994_v23 }
0x131c   :  { %v4908_v57 = vpop.eup %4907 }
0x131d   :  { %v4910_v37 = vpop.eup %4909  ;;  %v3999_v1 = vadd.f32 1.0, %v4908_v57 }
0x131e   :  { %v3998_v60 = vadd.f32 1.0, %v4910_v37 }
0x131f   :  { %v4001_v62 = vmul.f32 %v3999_v1, %v3985_v0 }
0x1320   :  { %v4000_v61 = vmul.f32 %v3998_v60, %v3984_v39 }
0x1322   :  { %4692 = vmatprep.mubr.msk.f32.mxu0 %vm2012_vm5, %v4000_v61 }
0x1323   :  { %4693 = vmatmul.mubr.msk.f32.vlgmr.msra.gmra.mrb[38].mxu0 %vm2012_vm5, %v4001_v62 }
0x13f6   :  { %v4694_v63 = vpop.f32.mrb[38].mxu0 }
0x13f7   :  { %v4097_v8 = vadd.f32 %v4694_v63, %v4240_v7  ;;  %v4091_v2 = vpop.f32.mrb[39].mxu0 }
0x13f8   :  { %v4092_v3 = vadd.f32 %v4240_v7, %v4091_v2 }
0x13f9   :  { %v4101_v4 = vadd.f32 %v4097_v8, %v5653_v58 }
0x13fa   :  { %v4100_v5 = vadd.f32 %v4092_v3, %v5656_v59 }
0x13fb   :  { %4103 = vst.msk [vmem:[#allocation10 + $0x8] sm:$0xff] %vm94_vm0, %v4101_v4 }
0x13fc   :  { %4102 = vst.msk [vmem:[#allocation10] sm:$0xff] %vm94_vm0, %v4100_v5 }
0x13fd   :  { %5010 = shalt.err (!%p5007_p8)
}
0x13fe   :  { %s5011_s28 = scalar_lea.hbm %s5735_s10, 256 }
0x13ff   :  { %p5012_p9 = scmp.ne.s32.totalorder %s5735_s10, %s5011_s28  ;;  %p5015_p10 = scmp.lt.u32.totalorder %s5011_s28, %s5735_s10 }
0x1401   :  { %p5017_p11 = pnand %p5015_p10, %p5012_p9 }
0x1403   :  { %5020 = shalt.err (!%p5017_p11)
}
0x1404   :  { %4115 = dma.vmem_to_hbm [thread:$0]  %s4110_s29, 256, %s5735_s10, [#allocation4], %s5033_s1, %s5033_s1, %s5034_s14  }
0x1405   :  { %5027 = dma.done.wait [#allocation4], 256  }
0x1406   :  { %5028 = vsyncadd [#allocation4], 4294967040 }
0x1407   :  { %4119 = vsyncpa [#allocation3], 1 }
0x1408   :  { %4120 = vsyncpa [#allocation6], 1 }
0x1409   :  { %4121 = vsyncpa [#allocation9], 1 }
0x140a   :  { %4122 = vsyncpa [#allocation4], 1 }

</bundles_post_ra>
